<compile_context>
chip_gen: v6e
topology: v6e:2x2x1
jax: 0.10.0
libtpu: 0.0.40
codegen_flags: <defaults>
</compile_context>

<pallas_src>
import jax
import jax.numpy as jnp
from jax.experimental import pallas as pl
from jax.experimental.pallas import tpu as pltpu

N_EMBED = 384              # matches the PyTorch module spec
HIDDEN  = 4 * N_EMBED      # 1536
H_CHUNK = 512              # hidden-dim chunk processed per inner step (divides 1536)


# ------------------------------ fused MLP kernel ------------------------------
def ffn_kernel(x_ref, w1_ref, b1_ref, w2_ref, b2_ref, o_ref):
    x = x_ref[...].astype(jnp.bfloat16)                       # (tm, C) bf16 for MXU
    tm = x.shape[0]
    C = o_ref.shape[-1]
    H = w1_ref.shape[-1]
    n_chunks = H // H_CHUNK

    # Accumulate the second matmul in f32 while walking the hidden dim in
    # lane-aligned chunks; the (tm, H) f32 intermediate never exists.
    acc = jnp.zeros((tm, C), jnp.float32)
    for c in range(n_chunks):                                  # 3 static iterations
        cs = c * H_CHUNK
        w1c = w1_ref[:, cs:cs + H_CHUNK]                       # (C, Hc) bf16, static slice
        b1c = b1_ref[:, cs:cs + H_CHUNK]                       # (1, Hc) f32
        h = jnp.dot(x, w1c, preferred_element_type=jnp.float32) + b1c
        h = jnp.maximum(h, 0.0).astype(jnp.bfloat16)           # ReLU, bf16 for MXU
        w2c = w2_ref[cs:cs + H_CHUNK, :]                       # (Hc, C) bf16, static slice
        acc = acc + jnp.dot(h, w2c, preferred_element_type=jnp.float32)

    o_ref[...] = (acc + b2_ref[...]).astype(o_ref.dtype)


def _round_up(n, m):
    return (n + m - 1) // m * m


# --------------------------------- wrapper ------------------------------------
def feed_forward(params, x, *, max_tile_rows=512):
    """x: (..., C) float32. Returns ReLU(x @ w1 + b1) @ w2 + b2 (dropout=identity)."""
    orig_shape = x.shape
    C = orig_shape[-1]
    H = params["w1"].shape[1]
    assert H % H_CHUNK == 0, "hidden dim must be a multiple of H_CHUNK"

    xf = x.reshape(-1, C)                     # flatten batch/seq -> (N, C)
    N = xf.shape[0]
    if N == 0:                                # degenerate empty input
        return jnp.zeros(orig_shape, x.dtype)

    # Row tile: multiple of 8, capped for VMEM safety on v5e/v7x.
    tm = min(max_tile_rows, _round_up(N, 8))
    # Ensure >= 2 grid steps when possible so "parallel" shards rows across
    # both v7x TensorCores (no effect on v5e/v6e).
    if pl.cdiv(N, tm) < 2 and N > 8:
        tm = _round_up(pl.cdiv(N, 2), 8)
    grid = (pl.cdiv(N, tm),)                  # ragged last block handled by Pallas

    resident = dict(pipeline_mode=pl.Buffered(1))   # constant index_map -> 1 buffer

    out = pl.pallas_call(
        ffn_kernel,
        out_shape=jax.ShapeDtypeStruct((N, C), x.dtype),
        grid=grid,
        in_specs=[
            pl.BlockSpec((tm, C), lambda i: (i, 0)),             # activations: row-tiled
            pl.BlockSpec((C, H), lambda i: (0, 0), **resident),  # w1: VMEM-resident bf16
            pl.BlockSpec((1, H), lambda i: (0, 0), **resident),  # b1
            pl.BlockSpec((H, C), lambda i: (0, 0), **resident),  # w2: VMEM-resident bf16
            pl.BlockSpec((1, C), lambda i: (0, 0), **resident),  # b2
        ],
        out_specs=pl.BlockSpec((tm, C), lambda i: (i, 0)),
        compiler_params=pltpu.CompilerParams(
            dimension_semantics=("parallel",),
            vmem_limit_bytes=64 * 1024 * 1024),
    )(xf, params["w1"], params["b1"], params["w2"], params["b2"])

    return out.reshape(orig_shape)


# ------------------------------ parameter init --------------------------------
def init_params(key):
    k1, k2, k3, k4 = jax.random.split(key, 4)
    nrm = lambda k, shape, s, dt: (s * jax.random.normal(k, shape)).astype(dt)
    return {
        "w1": nrm(k1, (N_EMBED, HIDDEN), 0.02, jnp.bfloat16),   # bf16 weights for MXU
        "b1": nrm(k3, (1, HIDDEN), 0.01, jnp.float32),
        "w2": nrm(k2, (HIDDEN, N_EMBED), 0.02, jnp.bfloat16),
        "b2": nrm(k4, (1, N_EMBED), 0.01, jnp.float32),
    }


# ----------------------------- pure-JAX reference -----------------------------
def _ref_forward(params, x):
    # Same numerics as the kernel: bf16 matmul inputs, f32 accumulation.
    xb = x.astype(jnp.bfloat16)
    h = jnp.dot(xb, params["w1"], preferred_element_type=jnp.float32) + params["b1"][0]
    h = jnp.maximum(h, 0.0).astype(jnp.bfloat16)
    return jnp.dot(h, params["w2"], preferred_element_type=jnp.float32) + params["b2"][0]


if __name__ == "__main__":
    key = jax.random.PRNGKey(0)
    pkey, xkey = jax.random.split(key)
    params = init_params(pkey)

    B, T = 2, 8                                    # small batch, short sequence
    x = jax.random.normal(xkey, (B, T, N_EMBED), dtype=jnp.float32)

    y = jax.block_until_ready(feed_forward(params, x))
    assert y.shape == (B, T, N_EMBED)

    ref = _ref_forward(params, x)
    assert jnp.allclose(y, ref, atol=2e-3, rtol=2e-3), "mismatch vs pure-JAX reference"

    print("KERNEL_OK")
</pallas_src>

<mosaic_0001>
module attributes {stable_mosaic.version = 11 : i64} {
  func.func @ffn_kernel(%arg0: i32, %arg1: memref<8x384xf32, #tpu.memory_space<vmem>>, %arg2: memref<384x1536xbf16, #tpu.memory_space<vmem>>, %arg3: memref<1x1536xf32, #tpu.memory_space<vmem>>, %arg4: memref<1536x384xbf16, #tpu.memory_space<vmem>>, %arg5: memref<1x384xf32, #tpu.memory_space<vmem>>, %arg6: memref<8x384xf32, #tpu.memory_space<vmem>>) attributes {dimension_semantics = [#tpu.dimension_semantics<parallel>], iteration_bounds = array<i64: 2>, scalar_prefetch = 0 : i64, scratch_operands = 0 : i64, tpu.core_type = #tpu.core_type<tc>, window_params = [{transform_indices = @transform_0, window_bounds = array<i64: 8, 384>}, {pipeline_mode = #tpu.pipeline_mode<synchronous>, transform_indices = @transform_1, window_bounds = array<i64: 384, 1536>}, {pipeline_mode = #tpu.pipeline_mode<synchronous>, transform_indices = @transform_2, window_bounds = array<i64: 1, 1536>}, {pipeline_mode = #tpu.pipeline_mode<synchronous>, transform_indices = @transform_3, window_bounds = array<i64: 1536, 384>}, {pipeline_mode = #tpu.pipeline_mode<synchronous>, transform_indices = @transform_4, window_bounds = array<i64: 1, 384>}, {transform_indices = @transform_5, window_bounds = array<i64: 8, 384>}]} {
    %c0 = arith.constant 0 : index
    %c0_0 = arith.constant 0 : index
    %0 = vector.load %arg1[%c0, %c0_0] : memref<8x384xf32, #tpu.memory_space<vmem>>, vector<8x384xf32>
    %1 = arith.truncf %0 : vector<8x384xf32> to vector<8x384xbf16>
    %cst = arith.constant 0.000000e+00 : f32
    %2 = vector.broadcast %cst : f32 to vector<8x384xf32>
    %c0_1 = arith.constant 0 : index
    %c0_2 = arith.constant 0 : index
    %3 = vector.load %arg2[%c0_1, %c0_2] : memref<384x1536xbf16, #tpu.memory_space<vmem>>, vector<384x512xbf16>
    %c0_3 = arith.constant 0 : index
    %c0_4 = arith.constant 0 : index
    %4 = vector.load %arg3[%c0_3, %c0_4] : memref<1x1536xf32, #tpu.memory_space<vmem>>, vector<1x512xf32>
    %cst_5 = arith.constant dense<0.000000e+00> : vector<8x512xf32>
    %5 = tpu.matmul %1, %3, %cst_5 {dimension_numbers = #tpu.dot_dimension_numbers<[1], [0], [0], [1], [0, 0, 1, 1], [], []>} : vector<8x384xbf16>, vector<384x512xbf16>, vector<8x512xf32> -> vector<8x512xf32>
    %6 = vector.broadcast %4 : vector<1x512xf32> to vector<8x512xf32>
    %7 = arith.addf %5, %6 : vector<8x512xf32>
    %cst_6 = arith.constant 0.000000e+00 : f32
    %8 = vector.broadcast %cst_6 : f32 to vector<8x512xf32>
    %9 = arith.maximumf %7, %8 : vector<8x512xf32>
    %10 = arith.truncf %9 : vector<8x512xf32> to vector<8x512xbf16>
    %c0_7 = arith.constant 0 : index
    %c0_8 = arith.constant 0 : index
    %11 = vector.load %arg4[%c0_7, %c0_8] : memref<1536x384xbf16, #tpu.memory_space<vmem>>, vector<512x384xbf16>
    %cst_9 = arith.constant dense<0.000000e+00> : vector<8x384xf32>
    %12 = tpu.matmul %10, %11, %cst_9 {dimension_numbers = #tpu.dot_dimension_numbers<[1], [0], [0], [1], [0, 0, 1, 1], [], []>} : vector<8x512xbf16>, vector<512x384xbf16>, vector<8x384xf32> -> vector<8x384xf32>
    %13 = arith.addf %2, %12 : vector<8x384xf32>
    %c0_10 = arith.constant 0 : index
    %c512 = arith.constant 512 : index
    %14 = vector.load %arg2[%c0_10, %c512] : memref<384x1536xbf16, #tpu.memory_space<vmem>>, vector<384x512xbf16>
    %c0_11 = arith.constant 0 : index
    %c512_12 = arith.constant 512 : index
    %15 = vector.load %arg3[%c0_11, %c512_12] : memref<1x1536xf32, #tpu.memory_space<vmem>>, vector<1x512xf32>
    %cst_13 = arith.constant dense<0.000000e+00> : vector<8x512xf32>
    %16 = tpu.matmul %1, %14, %cst_13 {dimension_numbers = #tpu.dot_dimension_numbers<[1], [0], [0], [1], [0, 0, 1, 1], [], []>} : vector<8x384xbf16>, vector<384x512xbf16>, vector<8x512xf32> -> vector<8x512xf32>
    %17 = vector.broadcast %15 : vector<1x512xf32> to vector<8x512xf32>
    %18 = arith.addf %16, %17 : vector<8x512xf32>
    %cst_14 = arith.constant 0.000000e+00 : f32
    %19 = vector.broadcast %cst_14 : f32 to vector<8x512xf32>
    %20 = arith.maximumf %18, %19 : vector<8x512xf32>
    %21 = arith.truncf %20 : vector<8x512xf32> to vector<8x512xbf16>
    %c512_15 = arith.constant 512 : index
    %c0_16 = arith.constant 0 : index
    %22 = vector.load %arg4[%c512_15, %c0_16] : memref<1536x384xbf16, #tpu.memory_space<vmem>>, vector<512x384xbf16>
    %cst_17 = arith.constant dense<0.000000e+00> : vector<8x384xf32>
    %23 = tpu.matmul %21, %22, %cst_17 {dimension_numbers = #tpu.dot_dimension_numbers<[1], [0], [0], [1], [0, 0, 1, 1], [], []>} : vector<8x512xbf16>, vector<512x384xbf16>, vector<8x384xf32> -> vector<8x384xf32>
    %24 = arith.addf %13, %23 : vector<8x384xf32>
    %c0_18 = arith.constant 0 : index
    %c1024 = arith.constant 1024 : index
    %25 = vector.load %arg2[%c0_18, %c1024] : memref<384x1536xbf16, #tpu.memory_space<vmem>>, vector<384x512xbf16>
    %c0_19 = arith.constant 0 : index
    %c1024_20 = arith.constant 1024 : index
    %26 = vector.load %arg3[%c0_19, %c1024_20] : memref<1x1536xf32, #tpu.memory_space<vmem>>, vector<1x512xf32>
    %cst_21 = arith.constant dense<0.000000e+00> : vector<8x512xf32>
    %27 = tpu.matmul %1, %25, %cst_21 {dimension_numbers = #tpu.dot_dimension_numbers<[1], [0], [0], [1], [0, 0, 1, 1], [], []>} : vector<8x384xbf16>, vector<384x512xbf16>, vector<8x512xf32> -> vector<8x512xf32>
    %28 = vector.broadcast %26 : vector<1x512xf32> to vector<8x512xf32>
    %29 = arith.addf %27, %28 : vector<8x512xf32>
    %cst_22 = arith.constant 0.000000e+00 : f32
    %30 = vector.broadcast %cst_22 : f32 to vector<8x512xf32>
    %31 = arith.maximumf %29, %30 : vector<8x512xf32>
    %32 = arith.truncf %31 : vector<8x512xf32> to vector<8x512xbf16>
    %c1024_23 = arith.constant 1024 : index
    %c0_24 = arith.constant 0 : index
    %33 = vector.load %arg4[%c1024_23, %c0_24] : memref<1536x384xbf16, #tpu.memory_space<vmem>>, vector<512x384xbf16>
    %cst_25 = arith.constant dense<0.000000e+00> : vector<8x384xf32>
    %34 = tpu.matmul %32, %33, %cst_25 {dimension_numbers = #tpu.dot_dimension_numbers<[1], [0], [0], [1], [0, 0, 1, 1], [], []>} : vector<8x512xbf16>, vector<512x384xbf16>, vector<8x384xf32> -> vector<8x384xf32>
    %35 = arith.addf %24, %34 : vector<8x384xf32>
    %c0_26 = arith.constant 0 : index
    %c0_27 = arith.constant 0 : index
    %36 = vector.load %arg5[%c0_26, %c0_27] : memref<1x384xf32, #tpu.memory_space<vmem>>, vector<1x384xf32>
    %37 = vector.broadcast %36 : vector<1x384xf32> to vector<8x384xf32>
    %38 = arith.addf %35, %37 : vector<8x384xf32>
    %c0_28 = arith.constant 0 : index
    %c0_29 = arith.constant 0 : index
    %39 = vector.load %arg6[%c0_28, %c0_29] : memref<8x384xf32, #tpu.memory_space<vmem>>, vector<8x384xf32>
    tpu.vector_store %arg6[%c0_28, %c0_29], %38 {strides = array<i32>} : memref<8x384xf32, #tpu.memory_space<vmem>>, vector<8x384xf32>,
    return
  }
  func.func @transform_0(%arg0: i32) -> (i32, i32) {
    %c0_i32 = arith.constant 0 : i32
    %c0_i32_0 = arith.constant 0 : i32
    return %arg0, %c0_i32 : i32, i32
  }
  func.func @transform_1(%arg0: i32) -> (i32, i32) {
    %c0_i32 = arith.constant 0 : i32
    %c0_i32_0 = arith.constant 0 : i32
    %c0_i32_1 = arith.constant 0 : i32
    return %c0_i32, %c0_i32_0 : i32, i32
  }
  func.func @transform_2(%arg0: i32) -> (i32, i32) {
    %c0_i32 = arith.constant 0 : i32
    %c0_i32_0 = arith.constant 0 : i32
    %c0_i32_1 = arith.constant 0 : i32
    return %c0_i32, %c0_i32_0 : i32, i32
  }
  func.func @transform_3(%arg0: i32) -> (i32, i32) {
    %c0_i32 = arith.constant 0 : i32
    %c0_i32_0 = arith.constant 0 : i32
    %c0_i32_1 = arith.constant 0 : i32
    return %c0_i32, %c0_i32_0 : i32, i32
  }
  func.func @transform_4(%arg0: i32) -> (i32, i32) {
    %c0_i32 = arith.constant 0 : i32
    %c0_i32_0 = arith.constant 0 : i32
    %c0_i32_1 = arith.constant 0 : i32
    return %c0_i32, %c0_i32_0 : i32, i32
  }
  func.func @transform_5(%arg0: i32) -> (i32, i32) {
    %c0_i32 = arith.constant 0 : i32
    %c0_i32_0 = arith.constant 0 : i32
    return %arg0, %c0_i32 : i32, i32
  }
}

</mosaic_0001>

<bundles_post_ra>
// kernel: tpu_custom_call.1
= control target key start
LH: loop header
LB: loop body
LE: loop exit
PB: predicated region body
PF: predicated region fallthrough
CT: control target
= control target key end

     0   :  { %10 = vsyncpa [#allocation3], 0  ;;  %s7376_s0 = inlined_call_operand.hbm [shape: f32[16,384], index: 0, kind: input, shape index: {}]   ;;  %s7377_s1 = inlined_call_operand.hbm [shape: bf16[384,1536], index: 1, kind: input, shape index: {}]   ;;  %s7378_s2 = inlined_call_operand.hbm [shape: f32[1,1536], index: 2, kind: input, shape index: {}]   ;;  %s7379_s3 = inlined_call_operand.hbm [shape: bf16[1536,384], index: 3, kind: input, shape index: {}]   ;;  %s7380_s4 = inlined_call_operand.hbm [shape: f32[1,384], index: 4, kind: input, shape index: {}]   ;;  %s7381_s5 = inlined_call_operand.hbm [shape: f32[16,384], index: 5, kind: output, shape index: {}]  }
   0x1   :  { %12 = vsyncpa [#allocation3 + $0x1], 0 }
   0x2   :  { %13 = vsyncpa [#allocation6], 0 }
   0x3   :  { %14 = vsyncpa [#allocation9], 0 }
   0x4   :  { %15 = vsyncpa [#allocation4], 0 }
   0x5   :  { %17 = vsyncpa [#allocation4 + $0x1], 0  ;;  %s7050_s18 = smov 0   ;;  %s7052_s19 = smov 0  }
   0x6   :  { %s7054_s20 = smov 0   ;;  %s7056_s21 = smov 0  }
   0x7 LB: > { %s7009_s22 = smov [#allocation5]   ;;  %s7071_s24 = sadd.s32 4294967295, %s7007_s21   ;;  %s7007_s21 = sphi %s7056_s21, %s7404_s21   ;;  %s7003_s20 = sphi %s7054_s20, %s7403_s20   ;;  %s6999_s19 = sphi %s7052_s19, %s7402_s19   ;;  %s6995_s18 = sphi %s7050_s18, %s7401_s18  }
   0x8   : > { %s176_s23 = sshll.u32 %s7009_s22, 4  ;;  %p5168_p0 = scmp.ge.s32.totalorder %s7007_s21, 1  ;;  %s177_s23 = int_to_ptr.vmem [resolvable:$true] %s176_s23 }
   0x9   : > { %p7382_p1 = scmp.eq.s32.totalorder %s7071_s24, 0  ;;  %p164_p2 = scmp.lt.s32.totalorder %s7007_s21, 3 }
   0xa   : > { %s7010_s26 = smov [#allocation8]   ;;  %s7011_s29 = smov [#allocation7]  }
   0xb   : > { %p7076_p3 = pnand %p5168_p0, %p164_p2  ;;  %s200_s27 = sshll.u32 %s7010_s26, 4  ;;  %s7089_s27 = int_to_ptr.vmem [resolvable:$true] %s200_s27 }
   0xc   : > { %s7091_s30 = sshll.u32 %s7011_s29, 4  ;;  %s6814_s6 = scalar_lea.vmem %s177_s23, 36864  ;;  %s191_s30 = int_to_ptr.vmem [resolvable:$true] %s7091_s30 }
   0xd   : > { %s7386_s25 = scalar_select %p7076_p3, 1, 0 }
   0xe   : > { %p5915_p5 = pneg %p7076_p3  ;;  %p6815_p8 = scmp.ne.s32.totalorder %s177_s23, %s6814_s6 }
   0xf   : > { %p6822_p11 = scmp.lt.s32.totalorder %s177_s23, %s177_s23  ;;  %p6823_p12 = scmp.lt.s32.totalorder %s6814_s6, %s6814_s6 }
  0x10   : > { %p7085_p6 = pnand %p5915_p5, %p7382_p1 }
  0x11   : > { %p6824_p13 = por %p6823_p12, %p6822_p11 }
  0x12   : > { %p6805_p7 = pneg %p7085_p6 }
  0x14   : > { %p6817_p9 = pnand %p6815_p8, %p6805_p7 }
  0x16   : > { %p6818_p10 = pneg %p6817_p9 }
  0x18   : > { %p6825_p0 = pnand %p6824_p13, %p6818_p10 }
  0x1a   : > { %6828 = shalt.err (!%p6825_p0)
}
  0x1b   : > { %s7012_s7 = smov 768   ;;  %s7013_s8 = smov 48  }
  0x1c   : > { %5918 = dma.hbm_to_vmem [thread:$0]  (!%p7085_p6), %s7377_s1, 36864, %s177_s23, [#allocation6], %s7012_s7, %s7012_s7, %s7013_s8  }
  0x1d   : > { %s6840_s11 = scalar_lea.vmem %s7089_s27, 36864  ;;  %p6848_p9 = scmp.lt.s32.totalorder %s7089_s27, %s7089_s27 }
  0x1e   : > { %p6841_p2 = scmp.ne.s32.totalorder %s7089_s27, %s6840_s11  ;;  %p6849_p10 = scmp.lt.s32.totalorder %s6840_s11, %s6840_s11 }
  0x20   : > { %p6843_p5 = pnand %p6841_p2, %p6805_p7  ;;  %p6850_p11 = por %p6849_p10, %p6848_p9 }
  0x22   : > { %p6844_p8 = pneg %p6843_p5 }
  0x24   : > { %p6851_p12 = pnand %p6850_p11, %p6844_p8 }
  0x26   : > { %6854 = shalt.err (!%p6851_p12)
}
  0x27   : > { %s7014_s12 = smov 192   ;;  %s7015_s13 = smov 12  }
  0x28   : > { %5924 = dma.hbm_to_vmem [thread:$0]  (!%p7085_p6), %s7379_s3, 36864, %s7089_s27, [#allocation9], %s7014_s12, %s7014_s12, %s7015_s13  }
  0x29   : > { %s6866_s16 = scalar_lea.vmem %s191_s30, 192  ;;  %p6874_p5 = scmp.lt.s32.totalorder %s191_s30, %s191_s30 }
  0x2a   : > { %p6867_p13 = scmp.ne.s32.totalorder %s191_s30, %s6866_s16  ;;  %p6875_p8 = scmp.lt.s32.totalorder %s6866_s16, %s6866_s16 }
  0x2c   : > { %p6869_p0 = pnand %p6867_p13, %p6805_p7  ;;  %p6876_p9 = por %p6875_p8, %p6874_p5 }
  0x2e   : > { %p6870_p2 = pneg %p6869_p0 }
  0x30   : > { %p6877_p10 = pnand %p6876_p9, %p6870_p2 }
  0x32   : > { %6880 = shalt.err (!%p6877_p10)
}
  0x33   : > { %5921 = dma.hbm_to_vmem [thread:$0]  (!%p7085_p6), %s7378_s2, 192, %s191_s30, [#allocation6]  }
  0x34   : > { %s7016_s23 = smov [#allocation10]  }
  0x35   : > { %s214_s26 = sshll.u32 %s7016_s23, 4  ;;  %s215_s26 = int_to_ptr.vmem [resolvable:$true] %s214_s26 }
  0x36   : > { %s6892_s27 = scalar_lea.vmem %s215_s26, 48  ;;  %s6899_s29 = scalar_lea.vmem %s215_s26, 64 }
  0x37   : > { %p6893_p11 = scmp.ne.s32.totalorder %s215_s26, %s6892_s27  ;;  %p6900_p0 = scmp.lt.s32.totalorder %s215_s26, %s215_s26 }
  0x38   : > { %p6901_p2 = scmp.lt.s32.totalorder %s6899_s29, %s6892_s27 }
  0x39   : > { %p6895_p12 = pnand %p6893_p11, %p6805_p7 }
  0x3a   : > { %p6902_p5 = por %p6901_p2, %p6900_p0 }
  0x3b   : > { %p6896_p13 = pneg %p6895_p12 }
  0x3d   : > { %p6903_p8 = pnand %p6902_p5, %p6896_p13 }
  0x3f   : > { %6906 = shalt.err (!%p6903_p8)
}
  0x40   : > { %5927 = dma.hbm_to_vmem [thread:$0]  (!%p7085_p6), %s7380_s4, 48, %s215_s26, [#allocation9]  }
  0x41   : > { %s5167_s30 = sadd.s32 4294967294, %s7007_s21   ;;  %s7135_s28 = sadd.s32 1, %s7007_s21  }
  0x42   : > { %s27_s8 = ssub.s32 %s7007_s21, %s7135_s28  ;;  %s30_s9 = sadd.s32 1, %s7003_s20 }
  0x43   : > { %p28_p7 = scmp.eq.s32.totalorder %s27_s8, 0  ;;  %p37_p9 = scmp.ne.s32.totalorder %s7003_s20, %s6999_s19 }
  0x44   : > { %p38_p10 = scmp.eq.s32.totalorder %s7007_s21, 0  ;;  %p43_p11 = scmp.ne.s32.totalorder %s6999_s19, %s6995_s18 }
  0x45   : > { %s7146_s10 = scalar_select %p28_p7, %s7003_s20, %s30_s9  }
  0x46   : > { %p39_p12 = por %p38_p10, %p37_p9  ;;  %p7150_p13 = por %p7382_p1, %p43_p11 }
  0x47   : > { %p151_p6 = scmp.eq.s32.totalorder %s7071_s24, 1  ;;  %p157_p0 = scmp.eq.s32.totalorder %s5167_s30, 1 }
  0x48   : > { %s7388_s11 = scalar_select %p7150_p13, 1, 0 }
  0x49   : > { %p5940_p2 = scmp.lt.s32.totalorder %s7007_s21, 2  ;;  %s225_s12 = sand.u32 1, %s7003_s20  }
  0x4a   : > { %p7157_p5 = por %p151_p6, %p37_p9  ;;  %p7161_p8 = por %p157_p0, %p43_p11 }
  0x4b   : > { %s5891_s15 = smul.u32 24, %s225_s12  ;;  %p7166_p7 = pnand %p5940_p2, %p39_p12 }
  0x4c   : > { %s7389_s13 = scalar_select %p7157_p5, 1, 0 }
  0x4d   : > { %s7390_s14 = scalar_select %p7161_p8, 1, 0 }
  0x4e   : > { %s5892_s16 = smul.u32 384, %s7007_s21  ;;  %s229_s27 = scalar_lea.vmem [#allocation2], %s5891_s15 }
  0x4f   : > { %s237_s29 = sshll.u32 %s229_s27, 4  ;;  %s226_s6 = scalar_lea.sflag [#allocation3], %s225_s12  ;;  %s238_s29 = int_to_ptr.vmem [resolvable:$true] %s237_s29 }
  0x50   : > { %s7173_s26 = scalar_lea.hbm %s7376_s0, %s5892_s16  ;;  %p6909_p10 = pneg %p7166_p7 }
  0x51   : > { %s6907_s7 = scalar_lea.hbm %s7173_s26, 384  ;;  %s6912_s9 = scalar_lea.hbm %s7376_s0, 768 }
  0x52   : > { %p6908_p9 = scmp.ne.s32.totalorder %s7173_s26, %s6907_s7  ;;  %p6913_p6 = scmp.lt.s32.totalorder %s7173_s26, %s7376_s0 }
  0x53   : > { %p6914_p0 = scmp.lt.s32.totalorder %s6912_s9, %s6907_s7 }
  0x54   : > { %p6910_p11 = pnand %p6909_p10, %p6908_p9 }
  0x55   : > { %p6915_p2 = por %p6914_p0, %p6913_p6 }
  0x56   : > { %p6911_p12 = pneg %p6910_p11 }
  0x58   : > { %p6916_p4 = pnand %p6915_p2, %p6911_p12 }
  0x5a   : > { %6919 = shalt.err (!%p6916_p4)
}
  0x5b   : > { %s6920_s15 = scalar_lea.vmem %s238_s29, 384  ;;  %s7017_s12 = smov [#allocation2]  }
  0x5c   : > { %p6921_p1 = scmp.ne.s32.totalorder %s238_s29, %s6920_s15  ;;  %s6925_s23 = sshll.u32 %s7017_s12, 4  ;;  %s6926_s23 = int_to_ptr.vmem [resolvable:$false] %s6925_s23 }
  0x5d   : > { %s6927_s27 = scalar_lea.vmem %s6926_s23, 768  ;;  %p6928_p9 = scmp.lt.s32.totalorder %s238_s29, %s6926_s23 }
  0x5e   : > { %p6923_p8 = pnand %p6921_p1, %p6909_p10  ;;  %p6929_p11 = scmp.lt.s32.totalorder %s6927_s27, %s6920_s15 }
  0x60   : > { %p6924_p5 = pneg %p6923_p8  ;;  %p6930_p13 = por %p6929_p11, %p6928_p9 }
  0x62   : > { %p6931_p3 = pnand %p6930_p13, %p6924_p5 }
  0x64   : > { %6934 = shalt.err (!%p6931_p3)
}
  0x65   : > { %5931 = dma.hbm_to_vmem [thread:$0]  (!%p7166_p7), %s7173_s26, 384, %s238_s29, %s226_s6  }
  0x66   : > { %p7392_p12 = scmp.ne.s32.totalorder %s7386_s25, 0 }
  0x67   : > { %s7192_s7 = sand.u32 (!%p7392_p12), 1, %s6999_s19   ;;  %p7393_p1 = scmp.ne.s32.totalorder (!%p7392_p12), %s7388_s11, 0 }
  0x68   : > { %246 = sbr.rel (%p7392_p12) target bundleno = 1190 (0x4a6), region = 40  ;;  %s249_s8 = scalar_lea.sflag (!%p7392_p12), [#allocation3], %s7192_s7 }
  0x69   : > { %s5893_s30 = smul.u32 (!%p7392_p12), 24, %s7192_s7 }
  0x6b   : > { %s7198_s9 = scalar_lea.vmem (!%p7392_p12), [#allocation2], %s5893_s30 }
  0x6d   : > { %6978 = dma.done.wait (%p7393_p1), %s249_s8, 384  }
  0x6e   : > { %6980 = vsyncadd (%p7393_p1), %s249_s8, 4294966912  ;;  %p7394_p3 = scmp.eq.s32.totalorder %s7071_s24, 0 }
  0x70   : > { %6982 = dma.done.wait (%p7394_p3), [#allocation6], 37056   ;;  %p7395_p4 = pmov %p7394_p3 }
  0x71   : > { %p7396_p13 = pmov %p7394_p3 }
  0x72   : > { %6984 = vsyncadd (%p7395_p4), [#allocation6], 4294930240 }
  0x73   : > { %6986 = dma.done.wait (%p7396_p13), [#allocation9], 36912   ;;  %p7397_p5 = pmov %p7394_p3 }
  0x74   : > { %v7018_v0 = vmov 0   ;;  %v5987_v1 = vld [vmem:[#allocation5 + $0x2a4] ss:$48 sps:$4 sm:$0xff]   ;;  %v5991_v3 = vld [vmem:[#allocation5 + $0x2a0] ss:$48 sps:$4 sm:$0xff]   ;;  %s294_s25 = scalar_lea.vmem [#allocation11], %s5893_s30 }
  0x75   : > { %6988 = vsyncadd (%p7397_p5), [#allocation9], 4294930384  ;;  %973 = vmatprep.mubr.bf16.mxu1 %v7018_v0  ;;  %v5989_v2 = vld [vmem:[#allocation5 + $0x8a4] ss:$48 sps:$4 sm:$0xff]   ;;  %900 = vmatprep.subr.bf16.mxu0 %v5987_v1  ;;  %v5992_v4 = vld [vmem:[#allocation5 + $0x8a0] ss:$48 sps:$4 sm:$0xff]  }
  0x76   : > { %941 = vmatprep.subr.bf16.mxu1 %v5989_v2  ;;  %v5993_v5 = vld [vmem:[#allocation5 + $0x244] ss:$48 sps:$4 sm:$0xff]   ;;  %901 = vmatpush1.bf16.msra.mxu0 %v5991_v3  ;;  %v5997_v7 = vld [vmem:[#allocation5 + $0x240] ss:$48 sps:$4 sm:$0xff]   ;;  %v6039_v35 = vld [vmem:[#allocation5 + $0x2ac] ss:$48 sps:$4 sm:$0xff]  }
  0x77   : > { %942 = vmatpush1.bf16.msra.mxu1 %v5992_v4  ;;  %v5995_v6 = vld [vmem:[#allocation5 + $0x844] ss:$48 sps:$4 sm:$0xff]   ;;  %902 = vmatprep.subr.bf16.mxu0 %v5993_v5  ;;  %v5998_v8 = vld [vmem:[#allocation5 + $0x840] ss:$48 sps:$4 sm:$0xff]   ;;  %v6037_v37 = vld [vmem:[#allocation5 + $0x2a8] ss:$48 sps:$4 sm:$0xff]  }
  0x78   : > { %943 = vmatprep.subr.bf16.mxu1 %v5995_v6  ;;  %v5999_v9 = vld [vmem:[#allocation5 + $0x1e4] ss:$48 sps:$4 sm:$0xff]   ;;  %v6003_v11 = vld [vmem:[#allocation5 + $0x1e0] ss:$48 sps:$4 sm:$0xff]   ;;  %v6045_v40 = vld [vmem:[#allocation5 + $0x24c] ss:$48 sps:$4 sm:$0xff]  }
  0x79   : > { %v6001_v10 = vld [vmem:[#allocation5 + $0x7e4] ss:$48 sps:$4 sm:$0xff]   ;;  %v6004_v12 = vld [vmem:[#allocation5 + $0x7e0] ss:$48 sps:$4 sm:$0xff]   ;;  %v6043_v41 = vld [vmem:[#allocation5 + $0x248] ss:$48 sps:$4 sm:$0xff]  }
  0x7a   : > { %903 = vmatpush1.bf16.msra.mxu0 %v5997_v7  ;;  %v6005_v13 = vld [vmem:[#allocation5 + $0x184] ss:$48 sps:$4 sm:$0xff]   ;;  %v6009_v15 = vld [vmem:[#allocation5 + $0x180] ss:$48 sps:$4 sm:$0xff]   ;;  %v6051_v44 = vld [vmem:[#allocation5 + $0x1ec] ss:$48 sps:$4 sm:$0xff]  }
  0x7b   : > { %944 = vmatpush1.bf16.msra.mxu1 %v5998_v8  ;;  %904 = vmatprep.subr.bf16.mxu0 %v5999_v9  ;;  %v6007_v14 = vld [vmem:[#allocation5 + $0x784] ss:$48 sps:$4 sm:$0xff]   ;;  %v6010_v16 = vld [vmem:[#allocation5 + $0x780] ss:$48 sps:$4 sm:$0xff]   ;;  %v6049_v45 = vld [vmem:[#allocation5 + $0x1e8] ss:$48 sps:$4 sm:$0xff]  }
  0x7c   : > { %945 = vmatprep.subr.bf16.mxu1 %v6001_v10  ;;  %v6011_v17 = vld [vmem:[#allocation5 + $0x124] ss:$48 sps:$4 sm:$0xff]   ;;  %v6015_v19 = vld [vmem:[#allocation5 + $0x120] ss:$48 sps:$4 sm:$0xff]   ;;  %v6057_v48 = vld [vmem:[#allocation5 + $0x18c] ss:$48 sps:$4 sm:$0xff]  }
  0x7d   : > { %v6013_v18 = vld [vmem:[#allocation5 + $0x724] ss:$48 sps:$4 sm:$0xff]   ;;  %v6016_v20 = vld [vmem:[#allocation5 + $0x720] ss:$48 sps:$4 sm:$0xff]   ;;  %v6055_v49 = vld [vmem:[#allocation5 + $0x188] ss:$48 sps:$4 sm:$0xff]  }
  0x7e   : > { %905 = vmatpush1.bf16.msra.mxu0 %v6003_v11  ;;  %v6017_v21 = vld [vmem:[#allocation5 + $0xc4] ss:$48 sps:$4 sm:$0xff]   ;;  %v6021_v23 = vld [vmem:[#allocation5 + $0xc0] ss:$48 sps:$4 sm:$0xff]   ;;  %v6063_v54 = vld [vmem:[#allocation5 + $0x12c] ss:$48 sps:$4 sm:$0xff]  }
  0x7f   : > { %946 = vmatpush1.bf16.msra.mxu1 %v6004_v12  ;;  %906 = vmatprep.subr.bf16.mxu0 %v6005_v13  ;;  %v6019_v22 = vld [vmem:[#allocation5 + $0x6c4] ss:$48 sps:$4 sm:$0xff]   ;;  %v6022_v24 = vld [vmem:[#allocation5 + $0x6c0] ss:$48 sps:$4 sm:$0xff]   ;;  %v6061_v55 = vld [vmem:[#allocation5 + $0x128] ss:$48 sps:$4 sm:$0xff]  }
  0x80   : > { %947 = vmatprep.subr.bf16.mxu1 %v6007_v14  ;;  %v6023_v25 = vld [vmem:[#allocation5 + $0x64] ss:$48 sps:$4 sm:$0xff]   ;;  %v6027_v27 = vld [vmem:[#allocation5 + $0x60] ss:$48 sps:$4 sm:$0xff]   ;;  %v6069_v58 = vld [vmem:[#allocation5 + $0xcc] ss:$48 sps:$4 sm:$0xff]  }
  0x81   : > { %v6025_v26 = vld [vmem:[#allocation5 + $0x664] ss:$48 sps:$4 sm:$0xff]   ;;  %v6028_v28 = vld [vmem:[#allocation5 + $0x660] ss:$48 sps:$4 sm:$0xff]   ;;  %v6067_v59 = vld [vmem:[#allocation5 + $0xc8] ss:$48 sps:$4 sm:$0xff]  }
  0x82   : > { %907 = vmatpush1.bf16.msra.mxu0 %v6009_v15  ;;  %v6029_v29 = vld [vmem:[#allocation5 + $0x4] ss:$48 sps:$4 sm:$0xff]   ;;  %v6033_v31 = vld [vmem:[#allocation5] ss:$48 sps:$4 sm:$0xff]   ;;  %v6075_v62 = vld [vmem:[#allocation5 + $0x6c] ss:$48 sps:$4 sm:$0xff]  }
  0x83   : > { %948 = vmatpush1.bf16.msra.mxu1 %v6010_v16  ;;  %908 = vmatprep.subr.bf16.mxu0 %v6011_v17  ;;  %v6031_v30 = vld [vmem:[#allocation5 + $0x604] ss:$48 sps:$4 sm:$0xff]   ;;  %v6034_v32 = vld [vmem:[#allocation5 + $0x600] ss:$48 sps:$4 sm:$0xff]   ;;  %v6073_v63 = vld [vmem:[#allocation5 + $0x68] ss:$48 sps:$4 sm:$0xff]  }
  0x84   : > { %949 = vmatprep.subr.bf16.mxu1 %v6013_v18  ;;  %v298_v33 = vld [vmem:[%s7198_s9 + $0x10] sm:$0xff]  ;;  %v297_v50 = vld [vmem:[%s7198_s9 + $0x8] sm:$0xff]  ;;  %v296_v6 = vld [vmem:[%s7198_s9] sm:$0xff]  ;;  %s5894_s11 = smul.u32 384, %s7071_s24  ;;  %s5059_s17 = sshll.u32 %s294_s25, 4  ;;  %s5060_s17 = int_to_ptr.vmem [resolvable:$true] %s5059_s17 }
  0x85   : > { %v6035_v34 = vld [vmem:[#allocation5 + $0x5a4] ss:$48 sps:$4 sm:$0xff]   ;;  %v7214_v36 = vpack.c.bf16 %v298_v33, %v298_v33  ;;  %v6040_v38 = vld [vmem:[#allocation5 + $0x5a0] ss:$48 sps:$4 sm:$0xff]   ;;  %v7218_v53 = vpack.c.bf16 %v297_v50, %v297_v50  ;;  %v6081_v3 = vld [vmem:[#allocation5 + $0xc] ss:$48 sps:$4 sm:$0xff]   ;;  %v7223_v9 = vpack.c.bf16 %v296_v6, %v296_v6 }
  0x86   : > { %909 = vmatpush1.bf16.msra.mxu0 %v6015_v19  ;;  %v6041_v39 = vld [vmem:[#allocation5 + $0x544] ss:$48 sps:$4 sm:$0xff]   ;;  %v6046_v42 = vld [vmem:[#allocation5 + $0x540] ss:$48 sps:$4 sm:$0xff]   ;;  %v6079_v4 = vld [vmem:[#allocation5 + $0x8] ss:$48 sps:$4 sm:$0xff]   ;;  %s5057_s6 = scalar_lea.hbm %s7381_s5, %s5894_s11 }
  0x87   : > { %950 = vmatpush1.bf16.msra.mxu1 %v6016_v20  ;;  %910 = vmatprep.subr.bf16.mxu0 %v6017_v21  ;;  %v6047_v43 = vld [vmem:[#allocation5 + $0x4e4] ss:$48 sps:$4 sm:$0xff]   ;;  %v6052_v46 = vld [vmem:[#allocation5 + $0x4e0] ss:$48 sps:$4 sm:$0xff]   ;;  %v6085_v7 = vld [vmem:[#allocation5 + $0x5ac] ss:$48 sps:$4 sm:$0xff]  }
  0x88   : > { %951 = vmatprep.subr.bf16.mxu1 %v6019_v22  ;;  %v6053_v47 = vld [vmem:[#allocation5 + $0x484] ss:$48 sps:$4 sm:$0xff]   ;;  %v6058_v51 = vld [vmem:[#allocation5 + $0x480] ss:$48 sps:$4 sm:$0xff]   ;;  %932 = vmatprep.mubr.bf16.mxu0 %v7218_v53  ;;  %v6088_v8 = vld [vmem:[#allocation5 + $0x8ac] ss:$48 sps:$4 sm:$0xff]  }
  0x89   : > { %v6059_v52 = vld [vmem:[#allocation5 + $0x424] ss:$48 sps:$4 sm:$0xff]   ;;  %v6064_v56 = vld [vmem:[#allocation5 + $0x420] ss:$48 sps:$4 sm:$0xff]   ;;  %v6083_v10 = vld [vmem:[#allocation5 + $0x5a8] ss:$48 sps:$4 sm:$0xff]  }
  0x8a   : > { %911 = vmatpush1.bf16.msra.mxu0 %v6021_v23  ;;  %v6065_v57 = vld [vmem:[#allocation5 + $0x3c4] ss:$48 sps:$4 sm:$0xff]   ;;  %v6070_v60 = vld [vmem:[#allocation5 + $0x3c0] ss:$48 sps:$4 sm:$0xff]   ;;  %v6086_v11 = vld [vmem:[#allocation5 + $0x8a8] ss:$48 sps:$4 sm:$0xff]  }
  0x8b   : > { %952 = vmatpush1.bf16.msra.mxu1 %v6022_v24  ;;  %912 = vmatprep.subr.bf16.mxu0 %v6023_v25  ;;  %v6071_v61 = vld [vmem:[#allocation5 + $0x364] ss:$48 sps:$4 sm:$0xff]   ;;  %v6076_v1 = vld [vmem:[#allocation5 + $0x360] ss:$48 sps:$4 sm:$0xff]   ;;  %v6091_v12 = vld [vmem:[#allocation5 + $0x54c] ss:$48 sps:$4 sm:$0xff]  }
  0x8c   : > { %953 = vmatprep.subr.bf16.mxu1 %v6025_v26  ;;  %v6077_v2 = vld [vmem:[#allocation5 + $0x304] ss:$48 sps:$4 sm:$0xff]   ;;  %v6082_v5 = vld [vmem:[#allocation5 + $0x300] ss:$48 sps:$4 sm:$0xff]   ;;  %v6094_v13 = vld [vmem:[#allocation5 + $0x84c] ss:$48 sps:$4 sm:$0xff]  }
  0x8d   : > { %v6089_v14 = vld [vmem:[#allocation5 + $0x548] ss:$48 sps:$4 sm:$0xff]   ;;  %v6097_v16 = vld [vmem:[#allocation5 + $0x4ec] ss:$48 sps:$4 sm:$0xff]   ;;  %v6148_v50 = vld [vmem:[#allocation5 + $0x7f4] ss:$48 sps:$4 sm:$0xff]  }
  0x8e   : > { %913 = vmatpush1.bf16.msra.mxu0 %v6027_v27  ;;  %v6092_v15 = vld [vmem:[#allocation5 + $0x848] ss:$48 sps:$4 sm:$0xff]   ;;  %v6100_v17 = vld [vmem:[#allocation5 + $0x7ec] ss:$48 sps:$4 sm:$0xff]   ;;  %v6170_v6 = vld [vmem:[#allocation5 + $0x670] ss:$48 sps:$4 sm:$0xff]  }
  0x8f   : > { %954 = vmatpush1.bf16.msra.mxu1 %v6028_v28  ;;  %914 = vmatprep.subr.bf16.mxu0 %v6029_v29  ;;  %v6095_v18 = vld [vmem:[#allocation5 + $0x4e8] ss:$48 sps:$4 sm:$0xff]   ;;  %v6103_v20 = vld [vmem:[#allocation5 + $0x48c] ss:$48 sps:$4 sm:$0xff]   ;;  %s5045_s22 = scalar_lea.sflag [#allocation4], %s7192_s7  ;;  %s6935_s16 = scalar_lea.vmem %s5060_s17, 384 }
  0x90   : > { %955 = vmatprep.subr.bf16.mxu1 %v6031_v30  ;;  %v6098_v19 = vld [vmem:[#allocation5 + $0x7e8] ss:$48 sps:$4 sm:$0xff]   ;;  %v6106_v21 = vld [vmem:[#allocation5 + $0x78c] ss:$48 sps:$4 sm:$0xff]   ;;  %p6936_p8 = scmp.ne.s32.totalorder %s5060_s17, %s6935_s16  ;;  %p7398_p7 = scmp.ne.s32.totalorder %s7389_s13, 0 }
  0x91   : > { %v6101_v22 = vld [vmem:[#allocation5 + $0x488] ss:$48 sps:$4 sm:$0xff]   ;;  %v6109_v24 = vld [vmem:[#allocation5 + $0x42c] ss:$48 sps:$4 sm:$0xff]   ;;  %s7019_s15 = smov [#allocation11]  }
  0x92   : > { %915 = vmatpush1.bf16.msra.mxu0 %v6033_v31  ;;  %v6104_v23 = vld [vmem:[#allocation5 + $0x788] ss:$48 sps:$4 sm:$0xff]   ;;  %v6112_v25 = vld [vmem:[#allocation5 + $0x72c] ss:$48 sps:$4 sm:$0xff]   ;;  %p6937_p10 = pnand %p6936_p8, %p7398_p7  ;;  %s6939_s12 = sshll.u32 %s7019_s15, 4  ;;  %s6940_s12 = int_to_ptr.vmem [resolvable:$false] %s6939_s12 }
  0x93   : > { %956 = vmatpush1.bf16.msra.mxu1 %v6034_v32  ;;  %916 = vmatprep.subr.bf16.mxu0 %v6035_v34  ;;  %v6107_v26 = vld [vmem:[#allocation5 + $0x428] ss:$48 sps:$4 sm:$0xff]   ;;  %v6115_v28 = vld [vmem:[#allocation5 + $0x3cc] ss:$48 sps:$4 sm:$0xff]   ;;  %s6941_s24 = scalar_lea.vmem %s6940_s12, 768  ;;  %p6942_p0 = scmp.lt.s32.totalorder %s5060_s17, %s6940_s12 }
  0x94   : > { %982 = vmatprep.subr.bf16.mxu1 %v6039_v35  ;;  %v6110_v27 = vld [vmem:[#allocation5 + $0x728] ss:$48 sps:$4 sm:$0xff]   ;;  %v6118_v29 = vld [vmem:[#allocation5 + $0x6cc] ss:$48 sps:$4 sm:$0xff]   ;;  %p6938_p6 = pneg %p6937_p10  ;;  %p6943_p2 = scmp.lt.s32.totalorder %s6941_s24, %s6935_s16 }
  0x95   : > { %v6113_v30 = vld [vmem:[#allocation5 + $0x3c8] ss:$48 sps:$4 sm:$0xff]   ;;  %v6121_v32 = vld [vmem:[#allocation5 + $0x36c] ss:$48 sps:$4 sm:$0xff]  }
  0x96   : > { %974 = vmatmul.mubr.bf16.vlgmr.msra.gmra.mxu1 %v7214_v36  ;;  %917 = vmatpush2.bf16.msra.mxu0 %v6040_v38  ;;  %v6116_v31 = vld [vmem:[#allocation5 + $0x6c8] ss:$48 sps:$4 sm:$0xff]   ;;  %v6124_v33 = vld [vmem:[#allocation5 + $0x66c] ss:$48 sps:$4 sm:$0xff]   ;;  %p6944_p9 = por %p6943_p2, %p6942_p0 }
  0x97   : > { %983 = vmatpush1.bf16.msra.mxu1 %v6037_v37  ;;  %918 = vmatprep.subr.bf16.mxu0 %v6041_v39  ;;  %v6119_v34 = vld [vmem:[#allocation5 + $0x368] ss:$48 sps:$4 sm:$0xff]   ;;  %v6127_v37 = vld [vmem:[#allocation5 + $0x30c] ss:$48 sps:$4 sm:$0xff]  }
  0x98   : > { %984 = vmatprep.subr.bf16.mxu1 %v6045_v40  ;;  %1014 = vmatprep.mubr.bf16.mxu1 %v7218_v53  ;;  %v6122_v35 = vld [vmem:[#allocation5 + $0x668] ss:$48 sps:$4 sm:$0xff]   ;;  %v6130_v38 = vld [vmem:[#allocation5 + $0x60c] ss:$48 sps:$4 sm:$0xff]   ;;  %p6945_p11 = pnand %p6944_p9, %p6938_p6 }
  0x99   : > { %v6125_v39 = vld [vmem:[#allocation5 + $0x308] ss:$48 sps:$4 sm:$0xff]  }
  0x9a   : > { %919 = vmatpush2.bf16.msra.mxu0 %v6046_v42  ;;  %v6128_v40 = vld [vmem:[#allocation5 + $0x608] ss:$48 sps:$4 sm:$0xff]   ;;  %v6136_v42 = vld [vmem:[#allocation5 + $0x8b4] ss:$48 sps:$4 sm:$0xff]  }
  0x9b   : > { %985 = vmatpush1.bf16.msra.mxu1 %v6043_v41  ;;  %920 = vmatprep.subr.bf16.mxu0 %v6047_v43  ;;  %v6133_v41 = vld [vmem:[#allocation5 + $0x2b4] ss:$48 sps:$4 sm:$0xff]   ;;  %v6131_v43 = vld [vmem:[#allocation5 + $0x2b0] ss:$48 sps:$4 sm:$0xff]  }
  0x9c   : > { %986 = vmatprep.subr.bf16.mxu1 %v6051_v44  ;;  %v6134_v44 = vld [vmem:[#allocation5 + $0x8b0] ss:$48 sps:$4 sm:$0xff]  }
  0x9e   : > { %921 = vmatpush2.bf16.msra.mxu0 %v6052_v46  ;;  %v6142_v46 = vld [vmem:[#allocation5 + $0x854] ss:$48 sps:$4 sm:$0xff]  }
  0x9f   : > { %987 = vmatpush1.bf16.msra.mxu1 %v6049_v45  ;;  %922 = vmatprep.subr.bf16.mxu0 %v6053_v47  ;;  %v6139_v45 = vld [vmem:[#allocation5 + $0x254] ss:$48 sps:$4 sm:$0xff]   ;;  %v6137_v47 = vld [vmem:[#allocation5 + $0x250] ss:$48 sps:$4 sm:$0xff]  }
  0xa0   : > { %988 = vmatprep.subr.bf16.mxu1 %v6057_v48  ;;  %v6140_v48 = vld [vmem:[#allocation5 + $0x850] ss:$48 sps:$4 sm:$0xff]  }
  0xa2   : > { %923 = vmatpush2.bf16.msra.mxu0 %v6058_v51  ;;  %v6143_v51 = vld [vmem:[#allocation5 + $0x1f0] ss:$48 sps:$4 sm:$0xff]  }
  0xa3   : > { %989 = vmatpush1.bf16.msra.mxu1 %v6055_v49  ;;  %924 = vmatprep.subr.bf16.mxu0 %v6059_v52  ;;  %v6145_v49 = vld [vmem:[#allocation5 + $0x1f4] ss:$48 sps:$4 sm:$0xff]   ;;  %v6146_v52 = vld [vmem:[#allocation5 + $0x7f0] ss:$48 sps:$4 sm:$0xff]  }
  0xa4   : > { %990 = vmatprep.subr.bf16.mxu1 %v6063_v54  ;;  %v6151_v54 = vld [vmem:[#allocation5 + $0x194] ss:$48 sps:$4 sm:$0xff]  }
  0xa6   : > { %925 = vmatpush2.bf16.msra.mxu0 %v6064_v56  ;;  %v6149_v56 = vld [vmem:[#allocation5 + $0x190] ss:$48 sps:$4 sm:$0xff]  }
  0xa7   : > { %991 = vmatpush1.bf16.msra.mxu1 %v6061_v55  ;;  %926 = vmatprep.subr.bf16.mxu0 %v6065_v57  ;;  %v6154_v55 = vld [vmem:[#allocation5 + $0x794] ss:$48 sps:$4 sm:$0xff]   ;;  %v6152_v57 = vld [vmem:[#allocation5 + $0x790] ss:$48 sps:$4 sm:$0xff]  }
  0xa8   : > { %992 = vmatprep.subr.bf16.mxu1 %v6069_v58  ;;  %v6157_v58 = vld [vmem:[#allocation5 + $0x134] ss:$48 sps:$4 sm:$0xff]  }
  0xaa   : > { %927 = vmatpush2.bf16.msra.mxu0 %v6070_v60  ;;  %v6155_v60 = vld [vmem:[#allocation5 + $0x130] ss:$48 sps:$4 sm:$0xff]  }
  0xab   : > { %993 = vmatpush1.bf16.msra.mxu1 %v6067_v59  ;;  %928 = vmatprep.subr.bf16.mxu0 %v6071_v61  ;;  %v6160_v59 = vld [vmem:[#allocation5 + $0x734] ss:$48 sps:$4 sm:$0xff]   ;;  %v6158_v61 = vld [vmem:[#allocation5 + $0x730] ss:$48 sps:$4 sm:$0xff]  }
  0xac   : > { %994 = vmatprep.subr.bf16.mxu1 %v6075_v62  ;;  %v6163_v62 = vld [vmem:[#allocation5 + $0xd4] ss:$48 sps:$4 sm:$0xff]  }
  0xae   : > { %929 = vmatpush2.bf16.msra.mxu0 %v6076_v1  ;;  %v6161_v1 = vld [vmem:[#allocation5 + $0xd0] ss:$48 sps:$4 sm:$0xff]  }
  0xaf   : > { %995 = vmatpush1.bf16.msra.mxu1 %v6073_v63  ;;  %930 = vmatprep.subr.bf16.mxu0 %v6077_v2  ;;  %v6166_v63 = vld [vmem:[#allocation5 + $0x6d4] ss:$48 sps:$4 sm:$0xff]   ;;  %v6164_v2 = vld [vmem:[#allocation5 + $0x6d0] ss:$48 sps:$4 sm:$0xff]  }
  0xb0   : > { %996 = vmatprep.subr.bf16.mxu1 %v6081_v3  ;;  %v6169_v3 = vld [vmem:[#allocation5 + $0x74] ss:$48 sps:$4 sm:$0xff]  }
  0xb2   : > { %931 = vmatpush2.bf16.msra.mxu0 %v6082_v5  ;;  %v6167_v5 = vld [vmem:[#allocation5 + $0x70] ss:$48 sps:$4 sm:$0xff]  }
  0xb3   : > { %997 = vmatpush1.bf16.msra.mxu1 %v6079_v4  ;;  %1023 = vmatprep.subr.bf16.mxu0 %v6088_v8  ;;  %v6172_v4 = vld [vmem:[#allocation5 + $0x674] ss:$48 sps:$4 sm:$0xff]  }
  0xb4   : > { %998 = vmatprep.subr.bf16.mxu1 %v6085_v7  ;;  %v6175_v7 = vld [vmem:[#allocation5 + $0x14] ss:$48 sps:$4 sm:$0xff]  }
  0xb5   : > { %933 = vmatmul.mubr.bf16.vlgmr.msra.gmra.mxu0 %v7223_v9  ;;  %v6178_v8 = vld [vmem:[#allocation5 + $0x614] ss:$48 sps:$4 sm:$0xff]  }
  0xb6   : > { %1024 = vmatpush1.bf16.msra.mxu0 %v6086_v11  ;;  %1055 = vmatprep.mubr.bf16.mxu0 %v7018_v0  ;;  %v6176_v11 = vld [vmem:[#allocation5 + $0x610] ss:$48 sps:$4 sm:$0xff]  }
  0xb7   : > { %999 = vmatpush2.bf16.msra.mxu1 %v6083_v10  ;;  %1025 = vmatprep.subr.bf16.mxu0 %v6094_v13  ;;  %v6173_v10 = vld [vmem:[#allocation5 + $0x10] ss:$48 sps:$4 sm:$0xff]   ;;  %v6184_v13 = vld [vmem:[#allocation5 + $0x2bc] ss:$48 sps:$4 sm:$0xff]  }
  0xb8   : > { %1000 = vmatprep.subr.bf16.mxu1 %v6091_v12  ;;  %v6181_v12 = vld [vmem:[#allocation5 + $0x5b4] ss:$48 sps:$4 sm:$0xff]  }
  0xba   : > { %1026 = vmatpush1.bf16.msra.mxu0 %v6092_v15  ;;  %v6182_v15 = vld [vmem:[#allocation5 + $0x2b8] ss:$48 sps:$4 sm:$0xff]  }
  0xbb   : > { %1001 = vmatpush2.bf16.msra.mxu1 %v6089_v14  ;;  %1027 = vmatprep.subr.bf16.mxu0 %v6100_v17  ;;  %v6179_v14 = vld [vmem:[#allocation5 + $0x5b0] ss:$48 sps:$4 sm:$0xff]   ;;  %v6190_v17 = vld [vmem:[#allocation5 + $0x25c] ss:$48 sps:$4 sm:$0xff]  }
  0xbc   : > { %1002 = vmatprep.subr.bf16.mxu1 %v6097_v16  ;;  %v6187_v16 = vld [vmem:[#allocation5 + $0x554] ss:$48 sps:$4 sm:$0xff]  }
  0xbe   : > { %1028 = vmatpush1.bf16.msra.mxu0 %v6098_v19  ;;  %v6188_v19 = vld [vmem:[#allocation5 + $0x258] ss:$48 sps:$4 sm:$0xff]  }
  0xbf   : > { %1003 = vmatpush2.bf16.msra.mxu1 %v6095_v18  ;;  %1029 = vmatprep.subr.bf16.mxu0 %v6106_v21  ;;  %v6185_v18 = vld [vmem:[#allocation5 + $0x550] ss:$48 sps:$4 sm:$0xff]   ;;  %v6196_v21 = vld [vmem:[#allocation5 + $0x1fc] ss:$48 sps:$4 sm:$0xff]  }
  0xc0   : > { %1004 = vmatprep.subr.bf16.mxu1 %v6103_v20  ;;  %v6193_v20 = vld [vmem:[#allocation5 + $0x4f4] ss:$48 sps:$4 sm:$0xff]  }
  0xc2   : > { %1030 = vmatpush1.bf16.msra.mxu0 %v6104_v23  ;;  %v6194_v23 = vld [vmem:[#allocation5 + $0x1f8] ss:$48 sps:$4 sm:$0xff]  }
  0xc3   : > { %1005 = vmatpush2.bf16.msra.mxu1 %v6101_v22  ;;  %1031 = vmatprep.subr.bf16.mxu0 %v6112_v25  ;;  %v6191_v22 = vld [vmem:[#allocation5 + $0x4f0] ss:$48 sps:$4 sm:$0xff]   ;;  %v6202_v25 = vld [vmem:[#allocation5 + $0x19c] ss:$48 sps:$4 sm:$0xff]  }
  0xc4   : > { %1006 = vmatprep.subr.bf16.mxu1 %v6109_v24  ;;  %v6199_v24 = vld [vmem:[#allocation5 + $0x494] ss:$48 sps:$4 sm:$0xff]  }
  0xc6   : > { %1032 = vmatpush1.bf16.msra.mxu0 %v6110_v27  ;;  %v6200_v27 = vld [vmem:[#allocation5 + $0x198] ss:$48 sps:$4 sm:$0xff]  }
  0xc7   : > { %1007 = vmatpush2.bf16.msra.mxu1 %v6107_v26  ;;  %1033 = vmatprep.subr.bf16.mxu0 %v6118_v29  ;;  %v6197_v26 = vld [vmem:[#allocation5 + $0x490] ss:$48 sps:$4 sm:$0xff]   ;;  %v6208_v29 = vld [vmem:[#allocation5 + $0x13c] ss:$48 sps:$4 sm:$0xff]  }
  0xc8   : > { %1008 = vmatprep.subr.bf16.mxu1 %v6115_v28  ;;  %v6205_v28 = vld [vmem:[#allocation5 + $0x434] ss:$48 sps:$4 sm:$0xff]  }
  0xca   : > { %1034 = vmatpush1.bf16.msra.mxu0 %v6116_v31  ;;  %v6206_v31 = vld [vmem:[#allocation5 + $0x138] ss:$48 sps:$4 sm:$0xff]  }
  0xcb   : > { %1009 = vmatpush2.bf16.msra.mxu1 %v6113_v30  ;;  %1035 = vmatprep.subr.bf16.mxu0 %v6124_v33  ;;  %v6203_v30 = vld [vmem:[#allocation5 + $0x430] ss:$48 sps:$4 sm:$0xff]   ;;  %v6214_v33 = vld [vmem:[#allocation5 + $0xdc] ss:$48 sps:$4 sm:$0xff]  }
  0xcc   : > { %1010 = vmatprep.subr.bf16.mxu1 %v6121_v32  ;;  %v6211_v32 = vld [vmem:[#allocation5 + $0x3d4] ss:$48 sps:$4 sm:$0xff]  }
  0xce   : > { %1036 = vmatpush1.bf16.msra.mxu0 %v6122_v35  ;;  %v6212_v35 = vld [vmem:[#allocation5 + $0xd8] ss:$48 sps:$4 sm:$0xff]  }
  0xcf   : > { %1011 = vmatpush2.bf16.msra.mxu1 %v6119_v34  ;;  %1037 = vmatprep.subr.bf16.mxu0 %v6130_v38  ;;  %v6209_v34 = vld [vmem:[#allocation5 + $0x3d0] ss:$48 sps:$4 sm:$0xff]   ;;  %v6220_v38 = vld [vmem:[#allocation5 + $0x7c] ss:$48 sps:$4 sm:$0xff]  }
  0xd0   : > { %1012 = vmatprep.subr.bf16.mxu1 %v6127_v37  ;;  %v6217_v37 = vld [vmem:[#allocation5 + $0x374] ss:$48 sps:$4 sm:$0xff]  }
  0xd2   : > { %1038 = vmatpush1.bf16.msra.mxu0 %v6128_v40  ;;  %v6218_v40 = vld [vmem:[#allocation5 + $0x78] ss:$48 sps:$4 sm:$0xff]  }
  0xd3   : > { %1013 = vmatpush2.bf16.msra.mxu1 %v6125_v39  ;;  %1798 = vmatprep.subr.bf16.mxu0 %v6133_v41  ;;  %v6215_v39 = vld [vmem:[#allocation5 + $0x370] ss:$48 sps:$4 sm:$0xff]   ;;  %v6223_v41 = vld [vmem:[#allocation5 + $0x314] ss:$48 sps:$4 sm:$0xff]  }
  0xd4   : > { %1839 = vmatprep.subr.bf16.mxu1 %v6136_v42  ;;  %v6226_v42 = vld [vmem:[#allocation5 + $0x1c] ss:$48 sps:$4 sm:$0xff]  }
  0xd5   : > { %1056 = vmatmul.mubr.bf16.vlgmr.msra.gmra.mxu0 %v7214_v36 }
  0xd6   : > { %1015 = vmatmul.mubr.bf16.vlgmr.msra.gmra.mxu1 %v7223_v9  ;;  %1799 = vmatpush1.bf16.msra.mxu0 %v6131_v43  ;;  %v6221_v43 = vld [vmem:[#allocation5 + $0x310] ss:$48 sps:$4 sm:$0xff]  }
  0xd7   : > { %1840 = vmatpush1.bf16.msra.mxu1 %v6134_v44  ;;  %1800 = vmatprep.subr.bf16.mxu0 %v6139_v45  ;;  %v6224_v44 = vld [vmem:[#allocation5 + $0x18] ss:$48 sps:$4 sm:$0xff]   ;;  %v6229_v45 = vld [vmem:[#allocation5 + $0x5bc] ss:$48 sps:$4 sm:$0xff]  }
  0xd8   : > { %1841 = vmatprep.subr.bf16.mxu1 %v6142_v46  ;;  %1871 = vmatprep.mubr.bf16.mxu1 %v7018_v0  ;;  %v6232_v46 = vld [vmem:[#allocation5 + $0x8bc] ss:$48 sps:$4 sm:$0xff]  }
  0xd9   : > { %1830 = vmatprep.mubr.bf16.mxu0 %v7218_v53 }
  0xda   : > { %1801 = vmatpush1.bf16.msra.mxu0 %v6137_v47  ;;  %v6227_v47 = vld [vmem:[#allocation5 + $0x5b8] ss:$48 sps:$4 sm:$0xff]  }
  0xdb   : > { %1842 = vmatpush1.bf16.msra.mxu1 %v6140_v48  ;;  %1802 = vmatprep.subr.bf16.mxu0 %v6145_v49  ;;  %v6230_v48 = vld [vmem:[#allocation5 + $0x8b8] ss:$48 sps:$4 sm:$0xff]   ;;  %v6235_v49 = vld [vmem:[#allocation5 + $0x55c] ss:$48 sps:$4 sm:$0xff]  }
  0xdc   : > { %1843 = vmatprep.subr.bf16.mxu1 %v6148_v50  ;;  %v6238_v50 = vld [vmem:[#allocation5 + $0x85c] ss:$48 sps:$4 sm:$0xff]  }
  0xde   : > { %1803 = vmatpush1.bf16.msra.mxu0 %v6143_v51  ;;  %v6233_v51 = vld [vmem:[#allocation5 + $0x558] ss:$48 sps:$4 sm:$0xff]  }
  0xdf   : > { %1844 = vmatpush1.bf16.msra.mxu1 %v6146_v52  ;;  %1804 = vmatprep.subr.bf16.mxu0 %v6151_v54  ;;  %v6236_v52 = vld [vmem:[#allocation5 + $0x858] ss:$48 sps:$4 sm:$0xff]   ;;  %v6241_v54 = vld [vmem:[#allocation5 + $0x4fc] ss:$48 sps:$4 sm:$0xff]  }
  0xe0   : > { %1845 = vmatprep.subr.bf16.mxu1 %v6154_v55  ;;  %v6244_v55 = vld [vmem:[#allocation5 + $0x7fc] ss:$48 sps:$4 sm:$0xff]  }
  0xe2   : > { %1805 = vmatpush1.bf16.msra.mxu0 %v6149_v56  ;;  %v6239_v56 = vld [vmem:[#allocation5 + $0x4f8] ss:$48 sps:$4 sm:$0xff]  }
  0xe3   : > { %1846 = vmatpush1.bf16.msra.mxu1 %v6152_v57  ;;  %1806 = vmatprep.subr.bf16.mxu0 %v6157_v58  ;;  %v6242_v57 = vld [vmem:[#allocation5 + $0x7f8] ss:$48 sps:$4 sm:$0xff]   ;;  %v6247_v58 = vld [vmem:[#allocation5 + $0x49c] ss:$48 sps:$4 sm:$0xff]  }
  0xe4   : > { %1847 = vmatprep.subr.bf16.mxu1 %v6160_v59  ;;  %v6250_v59 = vld [vmem:[#allocation5 + $0x79c] ss:$48 sps:$4 sm:$0xff]  }
  0xe6   : > { %1807 = vmatpush1.bf16.msra.mxu0 %v6155_v60  ;;  %v6245_v60 = vld [vmem:[#allocation5 + $0x498] ss:$48 sps:$4 sm:$0xff]  }
  0xe7   : > { %1848 = vmatpush1.bf16.msra.mxu1 %v6158_v61  ;;  %1808 = vmatprep.subr.bf16.mxu0 %v6163_v62  ;;  %v6248_v61 = vld [vmem:[#allocation5 + $0x798] ss:$48 sps:$4 sm:$0xff]   ;;  %v6253_v62 = vld [vmem:[#allocation5 + $0x43c] ss:$48 sps:$4 sm:$0xff]  }
  0xe8   : > { %1849 = vmatprep.subr.bf16.mxu1 %v6166_v63  ;;  %v6256_v63 = vld [vmem:[#allocation5 + $0x73c] ss:$48 sps:$4 sm:$0xff]  }
  0xea   : > { %1809 = vmatpush1.bf16.msra.mxu0 %v6161_v1  ;;  %v6251_v1 = vld [vmem:[#allocation5 + $0x438] ss:$48 sps:$4 sm:$0xff]  }
  0xeb   : > { %1850 = vmatpush1.bf16.msra.mxu1 %v6164_v2  ;;  %1810 = vmatprep.subr.bf16.mxu0 %v6169_v3  ;;  %v6254_v2 = vld [vmem:[#allocation5 + $0x738] ss:$48 sps:$4 sm:$0xff]   ;;  %v6259_v3 = vld [vmem:[#allocation5 + $0x3dc] ss:$48 sps:$4 sm:$0xff]  }
  0xec   : > { %1851 = vmatprep.subr.bf16.mxu1 %v6172_v4  ;;  %v6262_v4 = vld [vmem:[#allocation5 + $0x6dc] ss:$48 sps:$4 sm:$0xff]  }
  0xee   : > { %1811 = vmatpush1.bf16.msra.mxu0 %v6167_v5  ;;  %v6257_v5 = vld [vmem:[#allocation5 + $0x3d8] ss:$48 sps:$4 sm:$0xff]  }
  0xef   : > { %1852 = vmatpush1.bf16.msra.mxu1 %v6170_v6  ;;  %1812 = vmatprep.subr.bf16.mxu0 %v6175_v7  ;;  %v6260_v6 = vld [vmem:[#allocation5 + $0x6d8] ss:$48 sps:$4 sm:$0xff]   ;;  %v6265_v7 = vld [vmem:[#allocation5 + $0x37c] ss:$48 sps:$4 sm:$0xff]  }
  0xf0   : > { %1853 = vmatprep.subr.bf16.mxu1 %v6178_v8  ;;  %v6268_v8 = vld [vmem:[#allocation5 + $0x67c] ss:$48 sps:$4 sm:$0xff]  }
  0xf2   : > { %1813 = vmatpush1.bf16.msra.mxu0 %v6173_v10  ;;  %v6263_v10 = vld [vmem:[#allocation5 + $0x378] ss:$48 sps:$4 sm:$0xff]  }
  0xf3   : > { %1854 = vmatpush1.bf16.msra.mxu1 %v6176_v11  ;;  %1814 = vmatprep.subr.bf16.mxu0 %v6181_v12  ;;  %v6266_v11 = vld [vmem:[#allocation5 + $0x678] ss:$48 sps:$4 sm:$0xff]   ;;  %v6271_v12 = vld [vmem:[#allocation5 + $0x31c] ss:$48 sps:$4 sm:$0xff]  }
  0xf4   : > { %1880 = vmatprep.subr.bf16.mxu1 %v6184_v13  ;;  %v6274_v13 = vld [vmem:[#allocation5 + $0x61c] ss:$48 sps:$4 sm:$0xff]  }
  0xf6   : > { %1872 = vmatmul.mubr.bf16.vlgmr.msra.gmra.mxu1 %v7214_v36  ;;  %1815 = vmatpush2.bf16.msra.mxu0 %v6179_v14  ;;  %v6269_v14 = vld [vmem:[#allocation5 + $0x318] ss:$48 sps:$4 sm:$0xff]  }
  0xf7   : > { %1881 = vmatpush1.bf16.msra.mxu1 %v6182_v15  ;;  %1816 = vmatprep.subr.bf16.mxu0 %v6187_v16  ;;  %v6272_v15 = vld [vmem:[#allocation5 + $0x618] ss:$48 sps:$4 sm:$0xff]  }
  0xf8   : > { %1882 = vmatprep.subr.bf16.mxu1 %v6190_v17  ;;  %1912 = vmatprep.mubr.bf16.mxu1 %v7218_v53  ;;  %v6277_v16 = vld [vmem:[#allocation8 + $0x3ac] ss:$12 sps:$4 sm:$0xff]   ;;  %v6275_v17 = vld [vmem:[#allocation8 + $0x3a8] ss:$12 sps:$4 sm:$0xff]  }
  0xfa   : > { %1817 = vmatpush2.bf16.msra.mxu0 %v6185_v18  ;;  %v6280_v18 = vld [vmem:[#allocation8 + $0x394] ss:$12 sps:$4 sm:$0xff]  }
  0xfb   : > { %1883 = vmatpush1.bf16.msra.mxu1 %v6188_v19  ;;  %1818 = vmatprep.subr.bf16.mxu0 %v6193_v20  ;;  %v6278_v19 = vld [vmem:[#allocation8 + $0x390] ss:$12 sps:$4 sm:$0xff]  }
  0xfc   : > { %1884 = vmatprep.subr.bf16.mxu1 %v6196_v21  ;;  %v6283_v20 = vld [vmem:[#allocation8 + $0x37c] ss:$12 sps:$4 sm:$0xff]   ;;  %v6281_v21 = vld [vmem:[#allocation8 + $0x378] ss:$12 sps:$4 sm:$0xff]  }
  0xfe   : > { %1819 = vmatpush2.bf16.msra.mxu0 %v6191_v22  ;;  %v6286_v22 = vld [vmem:[#allocation8 + $0x364] ss:$12 sps:$4 sm:$0xff]  }
  0xff   : > { %1885 = vmatpush1.bf16.msra.mxu1 %v6194_v23  ;;  %1820 = vmatprep.subr.bf16.mxu0 %v6199_v24  ;;  %v6302_v23 = vld [vmem:[#allocation8 + $0x528] ss:$12 sps:$4 sm:$0xff]   ;;  %v6304_v24 = vld [vmem:[#allocation8 + $0x52c] ss:$12 sps:$4 sm:$0xff]  }
 0x100   : > { %1886 = vmatprep.subr.bf16.mxu1 %v6202_v25  ;;  %v6310_v25 = vld [vmem:[#allocation8 + $0x514] ss:$12 sps:$4 sm:$0xff]  }
 0x102   : > { %1821 = vmatpush2.bf16.msra.mxu0 %v6197_v26  ;;  %v6284_v26 = vld [vmem:[#allocation8 + $0x360] ss:$12 sps:$4 sm:$0xff]  }
 0x103   : > { %1887 = vmatpush1.bf16.msra.mxu1 %v6200_v27  ;;  %1822 = vmatprep.subr.bf16.mxu0 %v6205_v28  ;;  %v6289_v27 = vld [vmem:[#allocation8 + $0x34c] ss:$12 sps:$4 sm:$0xff]   ;;  %v6308_v28 = vld [vmem:[#allocation8 + $0x510] ss:$12 sps:$4 sm:$0xff]  }
 0x104   : > { %1888 = vmatprep.subr.bf16.mxu1 %v6208_v29  ;;  %v6316_v29 = vld [vmem:[#allocation8 + $0x4fc] ss:$12 sps:$4 sm:$0xff]  }
 0x106   : > { %1823 = vmatpush2.bf16.msra.mxu0 %v6203_v30  ;;  %v6287_v30 = vld [vmem:[#allocation8 + $0x348] ss:$12 sps:$4 sm:$0xff]  }
 0x107   : > { %1889 = vmatpush1.bf16.msra.mxu1 %v6206_v31  ;;  %1824 = vmatprep.subr.bf16.mxu0 %v6211_v32  ;;  %v6292_v31 = vld [vmem:[#allocation8 + $0x334] ss:$12 sps:$4 sm:$0xff]   ;;  %v6314_v32 = vld [vmem:[#allocation8 + $0x4f8] ss:$12 sps:$4 sm:$0xff]  }
 0x108   : > { %1890 = vmatprep.subr.bf16.mxu1 %v6214_v33  ;;  %v6322_v33 = vld [vmem:[#allocation8 + $0x4e4] ss:$12 sps:$4 sm:$0xff]  }
 0x10a   : > { %1825 = vmatpush2.bf16.msra.mxu0 %v6209_v34  ;;  %v6290_v34 = vld [vmem:[#allocation8 + $0x330] ss:$12 sps:$4 sm:$0xff]  }
 0x10b   : > { %1891 = vmatpush1.bf16.msra.mxu1 %v6212_v35  ;;  %1826 = vmatprep.subr.bf16.mxu0 %v6217_v37  ;;  %v6295_v35 = vld [vmem:[#allocation8 + $0x31c] ss:$12 sps:$4 sm:$0xff]   ;;  %v6320_v37 = vld [vmem:[#allocation8 + $0x4e0] ss:$12 sps:$4 sm:$0xff]  }
 0x10c   : > { %1892 = vmatprep.subr.bf16.mxu1 %v6220_v38  ;;  %v6328_v38 = vld [vmem:[#allocation8 + $0x4cc] ss:$12 sps:$4 sm:$0xff]  }
 0x10e   : > { %1827 = vmatpush2.bf16.msra.mxu0 %v6215_v39  ;;  %v6293_v39 = vld [vmem:[#allocation8 + $0x318] ss:$12 sps:$4 sm:$0xff]  }
 0x10f   : > { %1893 = vmatpush1.bf16.msra.mxu1 %v6218_v40  ;;  %1828 = vmatprep.subr.bf16.mxu0 %v6223_v41  ;;  %v6298_v40 = vld [vmem:[#allocation8 + $0x304] ss:$12 sps:$4 sm:$0xff]   ;;  %v6326_v41 = vld [vmem:[#allocation8 + $0x4c8] ss:$12 sps:$4 sm:$0xff]  }
 0x110   : > { %1894 = vmatprep.subr.bf16.mxu1 %v6226_v42  ;;  %v6334_v42 = vld [vmem:[#allocation8 + $0x4b4] ss:$12 sps:$4 sm:$0xff]  }
 0x112   : > { %1829 = vmatpush2.bf16.msra.mxu0 %v6221_v43  ;;  %v6296_v43 = vld [vmem:[#allocation8 + $0x300] ss:$12 sps:$4 sm:$0xff]  }
 0x113   : > { %1895 = vmatpush1.bf16.msra.mxu1 %v6224_v44  ;;  %1921 = vmatprep.subr.bf16.mxu0 %v6232_v46  ;;  %v6301_v44 = vld [vmem:[#allocation8 + $0x46c] ss:$12 sps:$4 sm:$0xff]   ;;  %v6299_v46 = vld [vmem:[#allocation8 + $0x468] ss:$12 sps:$4 sm:$0xff]  }
 0x114   : > { %1896 = vmatprep.subr.bf16.mxu1 %v6229_v45  ;;  %v6332_v45 = vld [vmem:[#allocation8 + $0x4b0] ss:$12 sps:$4 sm:$0xff]  }
 0x115   : > { %1831 = vmatmul.mubr.bf16.vlgmr.msra.gmra.mxu0 %v7223_v9 }
 0x116   : > { %1922 = vmatpush1.bf16.msra.mxu0 %v6230_v48  ;;  %1953 = vmatprep.mubr.bf16.mxu0 %v7018_v0 }
 0x117   : > { %1897 = vmatpush2.bf16.msra.mxu1 %v6227_v47  ;;  %1923 = vmatprep.subr.bf16.mxu0 %v6238_v50  ;;  %v6307_v47 = vld [vmem:[#allocation8 + $0x454] ss:$12 sps:$4 sm:$0xff]   ;;  %v6340_v50 = vld [vmem:[#allocation8 + $0x49c] ss:$12 sps:$4 sm:$0xff]  }
 0x118   : > { %1898 = vmatprep.subr.bf16.mxu1 %v6235_v49  ;;  %v6305_v49 = vld [vmem:[#allocation8 + $0x450] ss:$12 sps:$4 sm:$0xff]  }
 0x11a   : > { %1924 = vmatpush1.bf16.msra.mxu0 %v6236_v52  ;;  %v6313_v52 = vld [vmem:[#allocation8 + $0x43c] ss:$12 sps:$4 sm:$0xff]  }
 0x11b   : > { %1899 = vmatpush2.bf16.msra.mxu1 %v6233_v51  ;;  %1925 = vmatprep.subr.bf16.mxu0 %v6244_v55 }
 0x11c   : > { %1900 = vmatprep.subr.bf16.mxu1 %v6241_v54  ;;  %v6338_v54 = vld [vmem:[#allocation8 + $0x498] ss:$12 sps:$4 sm:$0xff]  }
 0x11e   : > { %1926 = vmatpush1.bf16.msra.mxu0 %v6242_v57  ;;  %v6346_v57 = vld [vmem:[#allocation8 + $0x484] ss:$12 sps:$4 sm:$0xff]  }
 0x11f   : > { %1901 = vmatpush2.bf16.msra.mxu1 %v6239_v56  ;;  %1927 = vmatprep.subr.bf16.mxu0 %v6250_v59  ;;  %v6311_v56 = vld [vmem:[#allocation8 + $0x438] ss:$12 sps:$4 sm:$0xff]  }
 0x120   : > { %1902 = vmatprep.subr.bf16.mxu1 %v6247_v58  ;;  %v6319_v59 = vld [vmem:[#allocation8 + $0x424] ss:$12 sps:$4 sm:$0xff]  }
 0x122   : > { %1928 = vmatpush1.bf16.msra.mxu0 %v6248_v61  ;;  %v6317_v61 = vld [vmem:[#allocation8 + $0x420] ss:$12 sps:$4 sm:$0xff]  }
 0x123   : > { %1903 = vmatpush2.bf16.msra.mxu1 %v6245_v60  ;;  %1929 = vmatprep.subr.bf16.mxu0 %v6256_v63  ;;  %v6344_v60 = vld [vmem:[#allocation8 + $0x480] ss:$12 sps:$4 sm:$0xff]  }
 0x124   : > { %1904 = vmatprep.subr.bf16.mxu1 %v6253_v62  ;;  %v6349_v62 = vld [vmem:[#allocation8 + $0x5ec] ss:$12 sps:$4 sm:$0xff]  }
 0x125   : > { %v6325_v63 = vld [vmem:[#allocation8 + $0x40c] ss:$12 sps:$4 sm:$0xff]  }
 0x126   : > { %1930 = vmatpush1.bf16.msra.mxu0 %v6254_v2  ;;  %v6323_v2 = vld [vmem:[#allocation8 + $0x408] ss:$12 sps:$4 sm:$0xff]  }
 0x127   : > { %1905 = vmatpush2.bf16.msra.mxu1 %v6251_v1  ;;  %1931 = vmatprep.subr.bf16.mxu0 %v6262_v4  ;;  %v6347_v1 = vld [vmem:[#allocation8 + $0x5e8] ss:$12 sps:$4 sm:$0xff]  }
 0x128   : > { %1906 = vmatprep.subr.bf16.mxu1 %v6259_v3  ;;  %v6352_v3 = vld [vmem:[#allocation8 + $0x5d0] ss:$12 sps:$4 sm:$0xff]   ;;  %v6354_v4 = vld [vmem:[#allocation8 + $0x5d4] ss:$12 sps:$4 sm:$0xff]  }
 0x12a   : > { %1932 = vmatpush1.bf16.msra.mxu0 %v6260_v6  ;;  %v400_v6 = vlaneseq }
 0x12b   : > { %1907 = vmatpush2.bf16.msra.mxu1 %v6257_v5  ;;  %1933 = vmatprep.subr.bf16.mxu0 %v6268_v8  ;;  %v6331_v5 = vld [vmem:[#allocation8 + $0x3f4] ss:$12 sps:$4 sm:$0xff]   ;;  %v6357_v8 = vld [vmem:[#allocation8 + $0x5b8] ss:$12 sps:$4 sm:$0xff]  }
 0x12c   : > { %1908 = vmatprep.subr.bf16.mxu1 %v6265_v7  ;;  %v6329_v7 = vld [vmem:[#allocation8 + $0x3f0] ss:$12 sps:$4 sm:$0xff]  }
 0x12e   : > { %1934 = vmatpush1.bf16.msra.mxu0 %v6266_v11  ;;  %v6337_v11 = vld [vmem:[#allocation8 + $0x3dc] ss:$12 sps:$4 sm:$0xff]  }
 0x12f   : > { %1909 = vmatpush2.bf16.msra.mxu1 %v6263_v10  ;;  %1935 = vmatprep.subr.bf16.mxu0 %v6274_v13  ;;  %v6359_v10 = vld [vmem:[#allocation8 + $0x5bc] ss:$12 sps:$4 sm:$0xff]   ;;  %v6335_v13 = vld [vmem:[#allocation8 + $0x3d8] ss:$12 sps:$4 sm:$0xff]  }
 0x130   : > { %1910 = vmatprep.subr.bf16.mxu1 %v6271_v12  ;;  %v401_v12 = vshrl.u32 %v400_v6, 7 }
 0x132   : > { %1936 = vmatpush1.bf16.msra.mxu0 %v6272_v15  ;;  %v6364_v15 = vld [vmem:[#allocation8 + $0x5a4] ss:$12 sps:$4 sm:$0xff]  }
 0x133   : > { %1911 = vmatpush2.bf16.msra.mxu1 %v6269_v14  ;;  %2610 = vmatprep.subr.bf16.mxu0 %v6277_v16  ;;  %v6362_v14 = vld [vmem:[#allocation8 + $0x5a0] ss:$12 sps:$4 sm:$0xff]   ;;  %v6343_v16 = vld [vmem:[#allocation8 + $0x3c4] ss:$12 sps:$4 sm:$0xff]  }
 0x134   : > { %2651 = vmatprep.subr.bf16.mxu1 %v6304_v24 }
 0x135   : > { %1954 = vmatmul.mubr.bf16.vlgmr.msra.gmra.mxu0 %v7214_v36 }
 0x136   : > { %1913 = vmatmul.mubr.bf16.vlgmr.msra.gmra.mxu1 %v7223_v9  ;;  %2611 = vmatpush1.bf16.msra.mxu0 %v6275_v17  ;;  %v398_v17 = vld [vmem:[#allocation7] sm:$0xf] }
 0x137   : > { %2612 = vmatprep.subr.bf16.mxu0 %v6280_v18  ;;  %2652 = vmatpush1.bf16.msra.mxu1 %v6302_v23  ;;  %v7241_v18 = vsub.s32 0, %v401_v12  ;;  %v7243_v23 = vsub.s32 1, %v401_v12 }
 0x138   : > { %2653 = vmatprep.subr.bf16.mxu1 %v6310_v25  ;;  %v6372_v25 = vld [vmem:[#allocation8 + $0x570] ss:$12 sps:$4 sm:$0xff]  }
 0x139   : > { %v403_v24 = vrot.slane %v398_v17, %v7241_v18 }
 0x13a   : > { %2613 = vmatpush1.bf16.msra.mxu0 %v6278_v19  ;;  %v6341_v19 = vld [vmem:[#allocation8 + $0x3c0] ss:$12 sps:$4 sm:$0xff]  }
 0x13b   : > { %2614 = vmatprep.subr.bf16.mxu0 %v6283_v20  ;;  %2654 = vmatpush1.bf16.msra.mxu1 %v6308_v28  ;;  %v6367_v20 = vld [vmem:[#allocation8 + $0x588] ss:$12 sps:$4 sm:$0xff]  }
 0x13c   : > { %2655 = vmatprep.subr.bf16.mxu1 %v6316_v29 }
 0x13e   : > { %2615 = vmatpush1.bf16.msra.mxu0 %v6281_v21  ;;  %v6369_v21 = vld [vmem:[#allocation8 + $0x58c] ss:$12 sps:$4 sm:$0xff]  }
 0x13f   : > { %2616 = vmatprep.subr.bf16.mxu0 %v6286_v22  ;;  %2656 = vmatpush1.bf16.msra.mxu1 %v6314_v32  ;;  %v6350_v22 = vld [vmem:[#allocation8 + $0x470] ss:$12 sps:$4 sm:$0xff]  }
 0x140   : > { %2657 = vmatprep.subr.bf16.mxu1 %v6322_v33 }
 0x142   : > { %2617 = vmatpush1.bf16.msra.mxu0 %v6284_v26  ;;  %v6374_v26 = vld [vmem:[#allocation8 + $0x574] ss:$12 sps:$4 sm:$0xff]  }
 0x143   : > { %2618 = vmatprep.subr.bf16.mxu0 %v6289_v27  ;;  %2658 = vmatpush1.bf16.msra.mxu1 %v6320_v37  ;;  %v407_v27 = vrot.slane %v398_v17, %v7243_v23 }
 0x144   : > { %2659 = vmatprep.subr.bf16.mxu1 %v6328_v38 }
 0x146   : > { %2619 = vmatpush1.bf16.msra.mxu0 %v6287_v30 }
 0x147   : > { %2620 = vmatprep.subr.bf16.mxu0 %v6292_v31  ;;  %2660 = vmatpush1.bf16.msra.mxu1 %v6326_v41  ;;  %v6379_v31 = vld [vmem:[#allocation8 + $0x55c] ss:$12 sps:$4 sm:$0xff]  }
 0x148   : > { %2661 = vmatprep.subr.bf16.mxu1 %v6334_v42  ;;  %v6387_v41 = vld [vmem:[#allocation8 + $0x5f0] ss:$12 sps:$4 sm:$0xff]   ;;  %v7253_v42 = vsub.s32 2, %v401_v12 }
 0x14a   : > { %2621 = vmatpush1.bf16.msra.mxu0 %v6290_v34  ;;  %v6377_v34 = vld [vmem:[#allocation8 + $0x558] ss:$12 sps:$4 sm:$0xff]  }
 0x14b   : > { %2622 = vmatprep.subr.bf16.mxu0 %v6295_v35  ;;  %2662 = vmatpush1.bf16.msra.mxu1 %v6332_v45 }
 0x14c   : > { %2663 = vmatprep.subr.bf16.mxu1 %v6340_v50 }
 0x14e   : > { %2623 = vmatpush1.bf16.msra.mxu0 %v6293_v39  ;;  %v6384_v39 = vld [vmem:[#allocation8 + $0x544] ss:$12 sps:$4 sm:$0xff]  }
 0x14f   : > { %2624 = vmatprep.subr.bf16.mxu0 %v6298_v40  ;;  %2664 = vmatpush1.bf16.msra.mxu1 %v6338_v54  ;;  %v6382_v40 = vld [vmem:[#allocation8 + $0x540] ss:$12 sps:$4 sm:$0xff]  }
 0x150   : > { %2665 = vmatprep.subr.bf16.mxu1 %v6346_v57 }
 0x152   : > { %2625 = vmatpush1.bf16.msra.mxu0 %v6296_v43  ;;  %v7255_v43 = vsub.s32 3, %v401_v12 }
 0x153   : > { %2626 = vmatprep.subr.bf16.mxu0 %v6301_v44  ;;  %2666 = vmatpush1.bf16.msra.mxu1 %v6344_v60  ;;  %v411_v44 = vrot.slane %v398_v17, %v7253_v42 }
 0x154   : > { %2667 = vmatprep.subr.bf16.mxu1 %v6349_v62  ;;  %v415_v45 = vrot.slane %v398_v17, %v7255_v43  ;;  %v6355_v17 = vld [vmem:[#allocation8 + $0x458] ss:$12 sps:$4 sm:$0xff]  }
 0x156   : > { %v7237_v48 = vpop.f32.mrf.mxu1  ;;  %2627 = vmatpush2.bf16.msra.mxu0 %v6299_v46 }
 0x157   : > { %2628 = vmatprep.subr.bf16.mxu0 %v6307_v47  ;;  %2668 = vmatpush2.bf16.msra.mxu1 %v6347_v1 }
 0x158   : > { %v7239_v51 = vpop.f32.mrf.mxu1  ;;  %2669 = vmatprep.subr.bf16.mxu1 %v6354_v4 }
 0x15a   : > { %v979_v55 = vpop.f32.mrf.mxu1  ;;  %2629 = vmatpush2.bf16.msra.mxu0 %v6305_v49 }
 0x15b   : > { %2630 = vmatprep.subr.bf16.mxu0 %v6313_v52  ;;  %2670 = vmatpush2.bf16.msra.mxu1 %v6352_v3 }
 0x15c   : > { %v980_v58 = vpop.f32.mrf.mxu1  ;;  %2671 = vmatprep.subr.bf16.mxu1 %v6359_v10 }
 0x15e   : > { %2631 = vmatpush2.bf16.msra.mxu0 %v6311_v56 }
 0x15f   : > { %2632 = vmatprep.subr.bf16.mxu0 %v6319_v59  ;;  %2672 = vmatpush2.bf16.msra.mxu1 %v6357_v8 }
 0x160   : > { %2673 = vmatprep.subr.bf16.mxu1 %v6364_v15  ;;  %v6351_v15 = vld [vmem:[#allocation8 + $0x3b0] ss:$12 sps:$4 sm:$0xff]  }
 0x162   : > { %2633 = vmatpush2.bf16.msra.mxu0 %v6317_v61 }
 0x163   : > { %2634 = vmatprep.subr.bf16.mxu0 %v6325_v63  ;;  %2674 = vmatpush2.bf16.msra.mxu1 %v6362_v14  ;;  %v1296_v63 = vld [vmem:[#allocation7 + $0x4] sm:$0xf] }
 0x164   : > { %2675 = vmatprep.subr.bf16.mxu1 %v6369_v21  ;;  %v1301_v1 = vrot.slane %v1296_v63, %v7241_v18  ;;  %v6361_v21 = vld [vmem:[#allocation8 + $0x380] ss:$12 sps:$4 sm:$0xff]  }
 0x166   : > { %2635 = vmatpush2.bf16.msra.mxu0 %v6323_v2  ;;  %v1305_v2 = vrot.slane %v1296_v63, %v7243_v23 }
 0x167   : > { %2636 = vmatprep.subr.bf16.mxu0 %v6331_v5  ;;  %2676 = vmatpush2.bf16.msra.mxu1 %v6367_v20  ;;  %v6360_v20 = vld [vmem:[#allocation8 + $0x440] ss:$12 sps:$4 sm:$0xff]  }
 0x168   : > { %2677 = vmatprep.subr.bf16.mxu1 %v6374_v26  ;;  %v6371_v26 = vld [vmem:[#allocation8 + $0x350] ss:$12 sps:$4 sm:$0xff]  }
 0x16a   : > { %2637 = vmatpush2.bf16.msra.mxu0 %v6329_v7 }
 0x16b   : > { %2638 = vmatprep.subr.bf16.mxu0 %v6337_v11  ;;  %2678 = vmatpush2.bf16.msra.mxu1 %v6372_v25  ;;  %v6370_v25 = vld [vmem:[#allocation8 + $0x410] ss:$12 sps:$4 sm:$0xff]  }
 0x16c   : > { %2679 = vmatprep.subr.bf16.mxu1 %v6379_v31  ;;  %v1313_v31 = vrot.slane %v1296_v63, %v7255_v43 }
 0x16e   : > { %2639 = vmatpush2.bf16.msra.mxu0 %v6335_v13 }
 0x16f   : > { %2640 = vmatprep.subr.bf16.mxu0 %v6343_v16  ;;  %2680 = vmatpush2.bf16.msra.mxu1 %v6377_v34 }
 0x170   : > { %2681 = vmatprep.subr.bf16.mxu1 %v6384_v39 }
 0x172   : > { %2641 = vmatpush2.bf16.msra.mxu0 %v6341_v19  ;;  %v6356_v19 = vld [vmem:[#allocation8 + $0x398] ss:$12 sps:$4 sm:$0xff]  }
 0x173   : > { %5759 = vmatprep.subr.bf16.mxu0 %v6350_v22  ;;  %2682 = vmatpush2.bf16.msra.mxu1 %v6382_v40  ;;  %v6365_v22 = vld [vmem:[#allocation8 + $0x428] ss:$12 sps:$4 sm:$0xff]  }
 0x174   : > { %5781 = vmatprep.subr.bf16.mxu1 %v6387_v41  ;;  %v6385_v41 = vld [vmem:[#allocation8 + $0x3c8] ss:$12 sps:$4 sm:$0xff]  }
 0x175   : > { %v934_v28 = vpop.f32.mrf.mxu0 }
 0x176   : > { %v935_v29 = vadd.f32 %v934_v28, %v403_v24  ;;  %v6366_v24 = vld [vmem:[#allocation8 + $0x368] ss:$12 sps:$4 sm:$0xff]   ;;  %v1309_v28 = vrot.slane %v1296_v63, %v7253_v42  ;;  %v6392_v63 = vld [vmem:[#allocation8 + $0x5d8] ss:$12 sps:$4 sm:$0xff]  }
 0x177   : > { %v936_v30 = vpop.f32.mrf.mxu0 }
 0x178   : > { %v7248_v32 = vadd.f32 %v7237_v48, %v935_v29  ;;  %v937_v33 = vadd.f32 %v936_v30, %v407_v27  ;;  %v6375_v27 = vld [vmem:[#allocation8 + $0x3f8] ss:$12 sps:$4 sm:$0xff]   ;;  %v6380_v30 = vld [vmem:[#allocation8 + $0x3e0] ss:$12 sps:$4 sm:$0xff]  }
 0x179   : > { %v938_v35 = vpop.f32.mrf.mxu0  ;;  %v6376_v29 = vld [vmem:[#allocation8 + $0x338] ss:$12 sps:$4 sm:$0xff]  }
 0x17a   : > { %v7251_v37 = vadd.f32 %v7239_v51, %v937_v33 }
 0x17b   : > { %v939_v38 = vpop.f32.mrf.mxu0 }
 0x17c   : > { %v6381_v38 = vld [vmem:[#allocation8 + $0x320] ss:$12 sps:$4 sm:$0xff]  }
 0x195   : > { %v1057_v47 = vpop.f32.mrf.mxu0 }
 0x196   : > { %v1016_v46 = vpop.f32.mrf.mxu1 }
 0x197   : > { %v1017_v48 = vadd.f32 %v1016_v46, %v411_v44  ;;  %v1059_v50 = vpop.f32.mrf.mxu0 }
 0x198   : > { %v1018_v49 = vpop.f32.mrf.mxu1 }
 0x199   : > { %v7259_v51 = vadd.f32 %v1057_v47, %v1017_v48  ;;  %v1019_v52 = vadd.f32 %v1018_v49, %v415_v45  ;;  %v1061_v55 = vpop.f32.mrf.mxu0  ;;  %v6386_v49 = vld [vmem:[#allocation8 + $0x308] ss:$12 sps:$4 sm:$0xff]  }
 0x19a   : > { %v1020_v54 = vpop.f32.mrf.mxu1  ;;  %v6390_v55 = vld [vmem:[#allocation8 + $0xac] ss:$12 sps:$4 sm:$0xff]  }
 0x19b   : > { %v7261_v56 = vadd.f32 %v1059_v50, %v1019_v52  ;;  %v1062_v58 = vpop.f32.mrf.mxu0 }
 0x19c   : > { %v1021_v57 = vpop.f32.mrf.mxu1  ;;  %v1065_v58 = vmax.f32 %v7251_v37, 0.0  ;;  %v6397_v37 = vld [vmem:[#allocation8 + $0x5c0] ss:$12 sps:$4 sm:$0xff]  }
 0x1b6   : > { %v1873_v59 = vpop.f32.mrf.mxu1 }
 0x1b8   : > { %v1875_v60 = vpop.f32.mrf.mxu1 }
 0x1ba   : > { %v1877_v61 = vpop.f32.mrf.mxu1 }
 0x1bb   : > { %v6391_v61 = vld [vmem:[#allocation8 + $0x530] ss:$12 sps:$4 sm:$0xff]  }
 0x1bc   : > { %v1878_v62 = vpop.f32.mrf.mxu1 }
 0x1d5   : > { %v1832_v3 = vpop.f32.mrf.mxu0 }
 0x1d6   : > { %v1833_v4 = vadd.f32 %v1832_v3, %v1301_v1  ;;  %v6395_v1 = vld [vmem:[#allocation8 + $0x94] ss:$12 sps:$4 sm:$0xff]   ;;  %v6393_v3 = vld [vmem:[#allocation8 + $0x90] ss:$12 sps:$4 sm:$0xff]  }
 0x1d7   : > { %v1834_v5 = vpop.f32.mrf.mxu0 }
 0x1d8   : > { %v1874_v6 = vadd.f32 %v1873_v59, %v1833_v4  ;;  %v1835_v7 = vadd.f32 %v1834_v5, %v1305_v2  ;;  %v7270_v2 = vpack.c.bf16 %v1065_v58, %v1065_v58  ;;  %v6396_v4 = vld [vmem:[#allocation8 + $0x518] ss:$12 sps:$4 sm:$0xff]   ;;  %v6400_v5 = vld [vmem:[#allocation8 + $0x7c] ss:$12 sps:$4 sm:$0xff]  }
 0x1d9   : > { %v1836_v8 = vpop.f32.mrf.mxu0  ;;  %v6451_v58 = vld [vmem:[#allocation8 + $0x108] ss:$12 sps:$4 sm:$0xff]  }
 0x1da   : > { %v1876_v10 = vadd.f32 %v1875_v60, %v1835_v7  ;;  %v1962_v11 = vmax.f32 %v1874_v6, 0.0  ;;  %v6388_v60 = vld [vmem:[#allocation8 + $0xa8] ss:$12 sps:$4 sm:$0xff]   ;;  %v6398_v6 = vld [vmem:[#allocation8 + $0x78] ss:$12 sps:$4 sm:$0xff]  }
 0x1db   : > { %v1837_v12 = vpop.f32.mrf.mxu0  ;;  %v6401_v7 = vld [vmem:[#allocation8 + $0x500] ss:$12 sps:$4 sm:$0xff]   ;;  %v6402_v8 = vld [vmem:[#allocation8 + $0x5a8] ss:$12 sps:$4 sm:$0xff]  }
 0x1dc   : > { %v1963_v13 = vmax.f32 %v1876_v10, 0.0  ;;  %v1966_v16 = vpack.c.bf16 %v1962_v11, %v1962_v11  ;;  %v6405_v10 = vld [vmem:[#allocation8 + $0x64] ss:$12 sps:$4 sm:$0xff]   ;;  %v6403_v11 = vld [vmem:[#allocation8 + $0x60] ss:$12 sps:$4 sm:$0xff]  }
 0x1dd   : > { %v6406_v12 = vld [vmem:[#allocation8 + $0x4e8] ss:$12 sps:$4 sm:$0xff]  }
 0x1de   : > { %v1967_v14 = vpack.c.bf16 %v1963_v13, %v1963_v13  ;;  %v6407_v13 = vld [vmem:[#allocation8 + $0x590] ss:$12 sps:$4 sm:$0xff]  }
 0x1e0   : > { %2642 = vmatprep.mubr.bf16.mxu0 %v1967_v14 }
 0x1e1   : > { %2643 = vmatmul.mubr.bf16.vlgmr.msra.gmra.mxu0 %v1966_v16 }
 0x1e2   : > { %5760 = vmatpush3.bf16.msra.mxu0 %v6351_v15  ;;  %2724 = vmatprep.mubr.bf16.mxu0 %v1967_v14  ;;  %v6410_v14 = vld [vmem:[#allocation8 + $0x4c] ss:$12 sps:$4 sm:$0xff]   ;;  %v6408_v15 = vld [vmem:[#allocation8 + $0x48] ss:$12 sps:$4 sm:$0xff]  }
 0x1e3   : > { %5761 = vmatprep.subr.bf16.mxu0 %v6355_v17  ;;  %v6412_v17 = vld [vmem:[#allocation8 + $0x578] ss:$12 sps:$4 sm:$0xff]  }
 0x1e6   : > { %5762 = vmatpush3.bf16.msra.mxu0 %v6356_v19  ;;  %v6415_v19 = vld [vmem:[#allocation8 + $0x34] ss:$12 sps:$4 sm:$0xff]  }
 0x1e7   : > { %5763 = vmatprep.subr.bf16.mxu0 %v6360_v20  ;;  %v6413_v20 = vld [vmem:[#allocation8 + $0x30] ss:$12 sps:$4 sm:$0xff]  }
 0x1ea   : > { %5764 = vmatpush3.bf16.msra.mxu0 %v6361_v21  ;;  %v6416_v21 = vld [vmem:[#allocation8 + $0x4b8] ss:$12 sps:$4 sm:$0xff]  }
 0x1eb   : > { %5765 = vmatprep.subr.bf16.mxu0 %v6365_v22  ;;  %v6417_v22 = vld [vmem:[#allocation8 + $0x560] ss:$12 sps:$4 sm:$0xff]  }
 0x1ee   : > { %5766 = vmatpush3.bf16.msra.mxu0 %v6366_v24  ;;  %v6420_v24 = vld [vmem:[#allocation8 + $0x1c] ss:$12 sps:$4 sm:$0xff]  }
 0x1ef   : > { %5767 = vmatprep.subr.bf16.mxu0 %v6370_v25  ;;  %v6418_v25 = vld [vmem:[#allocation8 + $0x18] ss:$12 sps:$4 sm:$0xff]  }
 0x1f2   : > { %5768 = vmatpush3.bf16.msra.mxu0 %v6371_v26  ;;  %v6421_v26 = vld [vmem:[#allocation8 + $0x4a0] ss:$12 sps:$4 sm:$0xff]  }
 0x1f3   : > { %5769 = vmatprep.subr.bf16.mxu0 %v6375_v27  ;;  %v6422_v27 = vld [vmem:[#allocation8 + $0x548] ss:$12 sps:$4 sm:$0xff]  }
 0x1f5   : > { %v1955_v34 = vpop.f32.mrf.mxu0 }
 0x1f6   : > { %v1914_v33 = vpop.f32.mrf.mxu1  ;;  %5770 = vmatpush3.bf16.msra.mxu0 %v6376_v29  ;;  %v6423_v29 = vld [vmem:[#allocation8] ss:$12 sps:$4 sm:$0xff]  }
 0x1f7   : > { %v1915_v35 = vadd.f32 %v1914_v33, %v1309_v28  ;;  %v1957_v40 = vpop.f32.mrf.mxu0  ;;  %5771 = vmatprep.subr.bf16.mxu0 %v6380_v30  ;;  %v6425_v28 = vld [vmem:[#allocation8 + $0x4] ss:$12 sps:$4 sm:$0xff]   ;;  %v6426_v30 = vld [vmem:[#allocation8 + $0x488] ss:$12 sps:$4 sm:$0xff]   ;;  %v6432_v33 = vld [vmem:[#allocation8 + $0x22c] ss:$12 sps:$4 sm:$0xff]  }
 0x1f8   : > { %v1916_v39 = vpop.f32.mrf.mxu1 }
 0x1f9   : > { %v1956_v44 = vadd.f32 %v1955_v34, %v1915_v35  ;;  %v1917_v45 = vadd.f32 %v1916_v39, %v1313_v31  ;;  %v1959_v47 = vpop.f32.mrf.mxu0  ;;  %v6429_v31 = vld [vmem:[#allocation8 + $0x16c] ss:$12 sps:$4 sm:$0xff]   ;;  %v1067_v34 = vmax.f32 %v7261_v56, 0.0  ;;  %v6427_v35 = vld [vmem:[#allocation8 + $0x168] ss:$12 sps:$4 sm:$0xff]  }
 0x1fa   : > { %v1918_v46 = vpop.f32.mrf.mxu1  ;;  %5772 = vmatpush3.bf16.msra.mxu0 %v6381_v38  ;;  %v6430_v38 = vld [vmem:[#allocation8 + $0x228] ss:$12 sps:$4 sm:$0xff]   ;;  %v6439_v47 = vld [vmem:[#allocation8 + $0x138] ss:$12 sps:$4 sm:$0xff]  }
 0x1fb   : > { %v1958_v48 = vadd.f32 %v1957_v40, %v1917_v45  ;;  %v1964_v50 = vmax.f32 %v1956_v44, 0.0  ;;  %v1960_v54 = vpop.f32.mrf.mxu0  ;;  %5773 = vmatprep.subr.bf16.mxu0 %v6385_v41  ;;  %v6435_v39 = vld [vmem:[#allocation8 + $0x154] ss:$12 sps:$4 sm:$0xff]   ;;  %v7275_v41 = vpack.c.bf16 %v1067_v34, %v1067_v34  ;;  %v6433_v44 = vld [vmem:[#allocation8 + $0x150] ss:$12 sps:$4 sm:$0xff]  }
 0x1fc   : > { %v1919_v52 = vpop.f32.mrf.mxu1  ;;  %v6438_v40 = vld [vmem:[#allocation8 + $0x214] ss:$12 sps:$4 sm:$0xff]   ;;  %v6436_v45 = vld [vmem:[#allocation8 + $0x210] ss:$12 sps:$4 sm:$0xff]   ;;  %v6503_v34 = vld [vmem:[#allocation8 + $0xf8] ss:$12 sps:$4 sm:$0xff]  }
 0x1fd   : > { %v1965_v57 = vmax.f32 %v1958_v48, 0.0  ;;  %v7268_v62 = vpack.c.bf16 %v1964_v50, %v1964_v50  ;;  %v6441_v56 = vld [vmem:[#allocation8 + $0x13c] ss:$12 sps:$4 sm:$0xff]   ;;  %v6442_v48 = vld [vmem:[#allocation8 + $0x1f8] ss:$12 sps:$4 sm:$0xff]  }
 0x1fe   : > { %5774 = vmatpush3.bf16.msra.mxu0 %v6386_v49  ;;  %v6444_v46 = vld [vmem:[#allocation8 + $0x1fc] ss:$12 sps:$4 sm:$0xff]   ;;  %v6447_v49 = vld [vmem:[#allocation8 + $0x124] ss:$12 sps:$4 sm:$0xff]   ;;  %v6445_v52 = vld [vmem:[#allocation8 + $0x120] ss:$12 sps:$4 sm:$0xff]  }
 0x1ff   : > { %v1969_v59 = vpack.c.bf16 %v1965_v57, %v1965_v57  ;;  %3284 = vmatprep.subr.bf16.mxu0 %v6390_v55  ;;  %v6450_v50 = vld [vmem:[#allocation8 + $0x1e4] ss:$12 sps:$4 sm:$0xff]   ;;  %v6448_v54 = vld [vmem:[#allocation8 + $0x1e0] ss:$12 sps:$4 sm:$0xff]  }
 0x200   : > { %v6453_v55 = vld [vmem:[#allocation8 + $0x10c] ss:$12 sps:$4 sm:$0xff]  }
 0x201   : > { %2683 = vmatprep.mubr.bf16.mxu1 %v1969_v59  ;;  %2725 = vmatmul.mubr.bf16.vlgmr.msra.gmra.mxu0 %v1966_v16  ;;  %v6411_v16 = vld [vmem:[#allocation8 + $0x4d0] ss:$12 sps:$4 sm:$0xff]   ;;  %v6456_v57 = vld [vmem:[#allocation8 + $0x1cc] ss:$12 sps:$4 sm:$0xff]  }
 0x202   : > { %2684 = vmatmul.mubr.bf16.vlgmr.msra.gmra.mxu1 %v7268_v62  ;;  %3285 = vmatpush1.bf16.msra.mxu0 %v6388_v60  ;;  %v6459_v60 = vld [vmem:[#allocation8 + $0xf4] ss:$12 sps:$4 sm:$0xff]  }
 0x203   : > { %5782 = vmatpush3.bf16.msra.mxu1 %v6391_v61  ;;  %3316 = vmatprep.mubr.bf16.mxu0 %v7270_v2  ;;  %v6462_v61 = vld [vmem:[#allocation8 + $0x1b4] ss:$12 sps:$4 sm:$0xff]  }
 0x204   : > { %2764 = vmatprep.mubr.bf16.mxu1 %v1969_v59  ;;  %5783 = vmatprep.subr.bf16.mxu1 %v6392_v63  ;;  %v6454_v59 = vld [vmem:[#allocation8 + $0x1c8] ss:$12 sps:$4 sm:$0xff]   ;;  %v6460_v63 = vld [vmem:[#allocation8 + $0x1b0] ss:$12 sps:$4 sm:$0xff]  }
 0x205   : > { %3286 = vmatprep.subr.bf16.mxu0 %v6395_v1  ;;  %v6465_v1 = vld [vmem:[#allocation8 + $0xdc] ss:$12 sps:$4 sm:$0xff]  }
 0x206   : > { %3287 = vmatpush1.bf16.msra.mxu0 %v6393_v3  ;;  %v6468_v3 = vld [vmem:[#allocation8 + $0x19c] ss:$12 sps:$4 sm:$0xff]  }
 0x207   : > { %5784 = vmatpush3.bf16.msra.mxu1 %v6396_v4  ;;  %3288 = vmatprep.subr.bf16.mxu0 %v6400_v5  ;;  %v6463_v4 = vld [vmem:[#allocation8 + $0xd8] ss:$12 sps:$4 sm:$0xff]  }
 0x208   : > { %5785 = vmatprep.subr.bf16.mxu1 %v6397_v37  ;;  %v6466_v37 = vld [vmem:[#allocation8 + $0x198] ss:$12 sps:$4 sm:$0xff]  }
 0x209   : > { %v6471_v5 = vld [vmem:[#allocation8 + $0xc4] ss:$12 sps:$4 sm:$0xff]  }
 0x20a   : > { %3289 = vmatpush1.bf16.msra.mxu0 %v6398_v6  ;;  %v6474_v6 = vld [vmem:[#allocation8 + $0x184] ss:$12 sps:$4 sm:$0xff]  }
 0x20b   : > { %5786 = vmatpush3.bf16.msra.mxu1 %v6401_v7  ;;  %3290 = vmatprep.subr.bf16.mxu0 %v6405_v10  ;;  %v6469_v7 = vld [vmem:[#allocation8 + $0xc0] ss:$12 sps:$4 sm:$0xff]   ;;  %v1064_v10 = vmax.f32 %v7248_v32, 0.0  ;;  %v6484_v32 = vld [vmem:[#allocation8 + $0x98] ss:$12 sps:$4 sm:$0xff]  }
 0x20c   : > { %5787 = vmatprep.subr.bf16.mxu1 %v6402_v8  ;;  %v6472_v8 = vld [vmem:[#allocation8 + $0x180] ss:$12 sps:$4 sm:$0xff]  }
 0x20e   : > { %3291 = vmatpush1.bf16.msra.mxu0 %v6403_v11  ;;  %v6477_v11 = vld [vmem:[#allocation8 + $0x2ec] ss:$12 sps:$4 sm:$0xff]  }
 0x20f   : > { %5788 = vmatpush3.bf16.msra.mxu1 %v6406_v12  ;;  %3292 = vmatprep.subr.bf16.mxu0 %v6410_v14  ;;  %v6478_v12 = vld [vmem:[#allocation8 + $0x170] ss:$12 sps:$4 sm:$0xff]  }
 0x210   : > { %5789 = vmatprep.subr.bf16.mxu1 %v6407_v13  ;;  %v6475_v13 = vld [vmem:[#allocation8 + $0x2e8] ss:$12 sps:$4 sm:$0xff]   ;;  %v6479_v14 = vld [vmem:[#allocation8 + $0xb0] ss:$12 sps:$4 sm:$0xff]  }
 0x212   : > { %3293 = vmatpush1.bf16.msra.mxu0 %v6408_v15  ;;  %v7280_v15 = vpack.c.bf16 %v1064_v10, %v1064_v10  ;;  %v6540_v10 = vld [vmem:[#allocation8 + $0x278] ss:$12 sps:$4 sm:$0xff]  }
 0x213   : > { %5790 = vmatpush3.bf16.msra.mxu1 %v6411_v16  ;;  %3294 = vmatprep.subr.bf16.mxu0 %v6415_v19  ;;  %v6482_v16 = vld [vmem:[#allocation8 + $0x2d4] ss:$12 sps:$4 sm:$0xff]   ;;  %v6480_v19 = vld [vmem:[#allocation8 + $0x2d0] ss:$12 sps:$4 sm:$0xff]  }
 0x214   : > { %5791 = vmatprep.subr.bf16.mxu1 %v6412_v17  ;;  %v6483_v17 = vld [vmem:[#allocation8 + $0x158] ss:$12 sps:$4 sm:$0xff]  }
 0x216   : > { %3295 = vmatpush1.bf16.msra.mxu0 %v6413_v20  ;;  %v6487_v20 = vld [vmem:[#allocation8 + $0x2bc] ss:$12 sps:$4 sm:$0xff]  }
 0x217   : > { %5792 = vmatpush3.bf16.msra.mxu1 %v6416_v21  ;;  %3296 = vmatprep.subr.bf16.mxu0 %v6420_v24  ;;  %v6488_v21 = vld [vmem:[#allocation8 + $0x140] ss:$12 sps:$4 sm:$0xff]  }
 0x218   : > { %5793 = vmatprep.subr.bf16.mxu1 %v6417_v22  ;;  %v6485_v22 = vld [vmem:[#allocation8 + $0x2b8] ss:$12 sps:$4 sm:$0xff]   ;;  %v6489_v24 = vld [vmem:[#allocation8 + $0x80] ss:$12 sps:$4 sm:$0xff]  }
 0x21a   : > { %3297 = vmatpush1.bf16.msra.mxu0 %v6418_v25  ;;  %v6492_v25 = vld [vmem:[#allocation8 + $0x2a4] ss:$12 sps:$4 sm:$0xff]  }
 0x21b   : > { %5794 = vmatpush3.bf16.msra.mxu1 %v6421_v26  ;;  %3298 = vmatprep.subr.bf16.mxu0 %v6425_v28  ;;  %v6493_v26 = vld [vmem:[#allocation8 + $0x128] ss:$12 sps:$4 sm:$0xff]  }
 0x21c   : > { %5795 = vmatprep.subr.bf16.mxu1 %v6422_v27  ;;  %v6490_v27 = vld [vmem:[#allocation8 + $0x2a0] ss:$12 sps:$4 sm:$0xff]   ;;  %v6494_v28 = vld [vmem:[#allocation8 + $0x68] ss:$12 sps:$4 sm:$0xff]  }
 0x21e   : > { %3299 = vmatpush1.bf16.msra.mxu0 %v6423_v29  ;;  %v6497_v29 = vld [vmem:[#allocation8 + $0x28c] ss:$12 sps:$4 sm:$0xff]  }
 0x21f   : > { %5796 = vmatpush3.bf16.msra.mxu1 %v6426_v30  ;;  %3300 = vmatprep.subr.bf16.mxu0 %v6429_v31  ;;  %v6495_v30 = vld [vmem:[#allocation8 + $0x288] ss:$12 sps:$4 sm:$0xff]   ;;  %v6499_v31 = vld [vmem:[#allocation8 + $0x50] ss:$12 sps:$4 sm:$0xff]  }
 0x220   : > { %3325 = vmatprep.subr.bf16.mxu1 %v6432_v33  ;;  %v6502_v33 = vld [vmem:[#allocation8 + $0x274] ss:$12 sps:$4 sm:$0xff]  }
 0x222   : > { %2765 = vmatmul.mubr.bf16.vlgmr.msra.gmra.mxu1 %v7268_v62  ;;  %3301 = vmatpush2.bf16.msra.mxu0 %v6427_v35  ;;  %v6457_v62 = vld [vmem:[#allocation8 + $0xf0] ss:$12 sps:$4 sm:$0xff]  }
 0x223   : > { %3326 = vmatpush1.bf16.msra.mxu1 %v6430_v38  ;;  %3357 = vmatprep.mubr.bf16.mxu1 %v7275_v41  ;;  %v6500_v35 = vld [vmem:[#allocation8 + $0x270] ss:$12 sps:$4 sm:$0xff]   ;;  %v6504_v38 = vld [vmem:[#allocation8 + $0x38] ss:$12 sps:$4 sm:$0xff]  }
 0x224   : > { %3302 = vmatprep.subr.bf16.mxu0 %v6435_v39  ;;  %3327 = vmatprep.subr.bf16.mxu1 %v6438_v40  ;;  %v6507_v39 = vld [vmem:[#allocation8 + $0x25c] ss:$12 sps:$4 sm:$0xff]   ;;  %v6508_v40 = vld [vmem:[#allocation8 + $0xe0] ss:$12 sps:$4 sm:$0xff]  }
 0x226   : > { %3303 = vmatpush2.bf16.msra.mxu0 %v6433_v44  ;;  %v6505_v44 = vld [vmem:[#allocation8 + $0x258] ss:$12 sps:$4 sm:$0xff]  }
 0x227   : > { %3328 = vmatpush1.bf16.msra.mxu1 %v6436_v45  ;;  %3304 = vmatprep.subr.bf16.mxu0 %v6441_v56  ;;  %v6509_v45 = vld [vmem:[#allocation8 + $0x20] ss:$12 sps:$4 sm:$0xff]   ;;  %v6512_v56 = vld [vmem:[#allocation8 + $0x244] ss:$12 sps:$4 sm:$0xff]  }
 0x228   : > { %3329 = vmatprep.subr.bf16.mxu1 %v6444_v46  ;;  %v6513_v46 = vld [vmem:[#allocation8 + $0xc8] ss:$12 sps:$4 sm:$0xff]  }
 0x22a   : > { %3305 = vmatpush2.bf16.msra.mxu0 %v6439_v47  ;;  %v6510_v47 = vld [vmem:[#allocation8 + $0x240] ss:$12 sps:$4 sm:$0xff]  }
 0x22b   : > { %3330 = vmatpush1.bf16.msra.mxu1 %v6442_v48  ;;  %3306 = vmatprep.subr.bf16.mxu0 %v6447_v49  ;;  %v6514_v48 = vld [vmem:[#allocation8 + $0x8] ss:$12 sps:$4 sm:$0xff]   ;;  %v1066_v49 = vmax.f32 %v7259_v51, 0.0  ;;  %v6524_v51 = vld [vmem:[#allocation8 + $0x218] ss:$12 sps:$4 sm:$0xff]  }
 0x22c   : > { %3331 = vmatprep.subr.bf16.mxu1 %v6450_v50  ;;  %v6515_v50 = vld [vmem:[#allocation8 + $0x2f0] ss:$12 sps:$4 sm:$0xff]  }
 0x22e   : > { %3307 = vmatpush2.bf16.msra.mxu0 %v6445_v52  ;;  %v6518_v52 = vld [vmem:[#allocation5 + $0x2c4] ss:$48 sps:$4 sm:$0xff]  }
 0x22f   : > { %3332 = vmatpush1.bf16.msra.mxu1 %v6448_v54  ;;  %3308 = vmatprep.subr.bf16.mxu0 %v6453_v55  ;;  %v6519_v54 = vld [vmem:[#allocation8 + $0x230] ss:$12 sps:$4 sm:$0xff]   ;;  %v7285_v55 = vpack.c.bf16 %v1066_v49, %v1066_v49  ;;  %v6588_v49 = vld [vmem:[#allocation5 + $0x6e0] ss:$48 sps:$4 sm:$0xff]  }
 0x230   : > { %3333 = vmatprep.subr.bf16.mxu1 %v6456_v57  ;;  %v6516_v57 = vld [vmem:[#allocation5 + $0x2c0] ss:$48 sps:$4 sm:$0xff]  }
 0x232   : > { %3309 = vmatpush2.bf16.msra.mxu0 %v6451_v58  ;;  %v6520_v58 = vld [vmem:[#allocation8 + $0x2d8] ss:$12 sps:$4 sm:$0xff]  }
 0x233   : > { %3334 = vmatpush1.bf16.msra.mxu1 %v6454_v59  ;;  %3310 = vmatprep.subr.bf16.mxu0 %v6459_v60  ;;  %v6523_v59 = vld [vmem:[#allocation5 + $0x264] ss:$48 sps:$4 sm:$0xff]   ;;  %v6521_v60 = vld [vmem:[#allocation5 + $0x260] ss:$48 sps:$4 sm:$0xff]  }
 0x234   : > { %3335 = vmatprep.subr.bf16.mxu1 %v6462_v61  ;;  %v6525_v61 = vld [vmem:[#allocation8 + $0x2c0] ss:$12 sps:$4 sm:$0xff]  }
 0x236   : > { %3311 = vmatpush2.bf16.msra.mxu0 %v6457_v62  ;;  %v6528_v62 = vld [vmem:[#allocation5 + $0x204] ss:$48 sps:$4 sm:$0xff]  }
 0x237   : > { %3336 = vmatpush1.bf16.msra.mxu1 %v6460_v63  ;;  %3312 = vmatprep.subr.bf16.mxu0 %v6465_v1  ;;  %v6529_v63 = vld [vmem:[#allocation8 + $0x200] ss:$12 sps:$4 sm:$0xff]   ;;  %v6526_v1 = vld [vmem:[#allocation5 + $0x200] ss:$48 sps:$4 sm:$0xff]  }
 0x238   : > { %3337 = vmatprep.subr.bf16.mxu1 %v6468_v3  ;;  %v6530_v3 = vld [vmem:[#allocation8 + $0x2a8] ss:$12 sps:$4 sm:$0xff]  }
 0x23a   : > { %3313 = vmatpush2.bf16.msra.mxu0 %v6463_v4  ;;  %v6533_v4 = vld [vmem:[#allocation5 + $0x1a4] ss:$48 sps:$4 sm:$0xff]  }
 0x23b   : > { %3338 = vmatpush1.bf16.msra.mxu1 %v6466_v37  ;;  %3314 = vmatprep.subr.bf16.mxu0 %v6471_v5  ;;  %v6534_v37 = vld [vmem:[#allocation8 + $0x1e8] ss:$12 sps:$4 sm:$0xff]   ;;  %v6535_v5 = vld [vmem:[#allocation8 + $0x290] ss:$12 sps:$4 sm:$0xff]  }
 0x23c   : > { %3339 = vmatprep.subr.bf16.mxu1 %v6474_v6  ;;  %v6538_v6 = vld [vmem:[#allocation5 + $0x144] ss:$48 sps:$4 sm:$0xff]  }
 0x23e   : > { %3315 = vmatpush2.bf16.msra.mxu0 %v6469_v7  ;;  %v6539_v7 = vld [vmem:[#allocation8 + $0x1d0] ss:$12 sps:$4 sm:$0xff]  }
 0x23f   : > { %3340 = vmatpush1.bf16.msra.mxu1 %v6472_v8  ;;  %5803 = vmatprep.subr.bf16.mxu0 %v6478_v12  ;;  %v6536_v8 = vld [vmem:[#allocation5 + $0x140] ss:$48 sps:$4 sm:$0xff]  }
 0x240   : > { %3341 = vmatprep.subr.bf16.mxu1 %v6477_v11  ;;  %v6543_v11 = vld [vmem:[#allocation5 + $0xe4] ss:$48 sps:$4 sm:$0xff]  }
 0x241   : > { %3317 = vmatmul.mubr.bf16.vlgmr.msra.gmra.mxu0 %v7280_v15  ;;  %v6544_v12 = vld [vmem:[#allocation8 + $0x1b8] ss:$12 sps:$4 sm:$0xff]  }
 0x242   : > { %5804 = vmatpush3.bf16.msra.mxu0 %v6479_v14  ;;  %3398 = vmatprep.mubr.bf16.mxu0 %v7270_v2  ;;  %v6498_v2 = vld [vmem:[#allocation8 + $0x110] ss:$12 sps:$4 sm:$0xff]   ;;  %v6545_v14 = vld [vmem:[#allocation8 + $0x260] ss:$12 sps:$4 sm:$0xff]  }
 0x243   : > { %3342 = vmatpush2.bf16.msra.mxu1 %v6475_v13  ;;  %5805 = vmatprep.subr.bf16.mxu0 %v6483_v17  ;;  %v6541_v13 = vld [vmem:[#allocation5 + $0xe0] ss:$48 sps:$4 sm:$0xff]  }
 0x244   : > { %3343 = vmatprep.subr.bf16.mxu1 %v6482_v16  ;;  %v6549_v16 = vld [vmem:[#allocation8 + $0x1a0] ss:$12 sps:$4 sm:$0xff]   ;;  %v6546_v17 = vld [vmem:[#allocation5 + $0x80] ss:$48 sps:$4 sm:$0xff]  }
 0x246   : > { %5806 = vmatpush3.bf16.msra.mxu0 %v6484_v32  ;;  %v6553_v32 = vld [vmem:[#allocation5 + $0x24] ss:$48 sps:$4 sm:$0xff]  }
 0x247   : > { %3344 = vmatpush2.bf16.msra.mxu1 %v6480_v19  ;;  %5807 = vmatprep.subr.bf16.mxu0 %v6488_v21  ;;  %v6550_v19 = vld [vmem:[#allocation8 + $0x248] ss:$12 sps:$4 sm:$0xff]  }
 0x248   : > { %3345 = vmatprep.subr.bf16.mxu1 %v6487_v20  ;;  %v6554_v20 = vld [vmem:[#allocation8 + $0x188] ss:$12 sps:$4 sm:$0xff]  }
 0x249   : > { %v6551_v21 = vld [vmem:[#allocation5 + $0x20] ss:$48 sps:$4 sm:$0xff]  }
 0x24a   : > { %5808 = vmatpush3.bf16.msra.mxu0 %v6489_v24  ;;  %v6557_v24 = vld [vmem:[#allocation5 + $0x5c4] ss:$48 sps:$4 sm:$0xff]  }
 0x24b   : > { %3346 = vmatpush2.bf16.msra.mxu1 %v6485_v22  ;;  %5809 = vmatprep.subr.bf16.mxu0 %v6493_v26  ;;  %v6560_v22 = vld [vmem:[#allocation5 + $0x8c4] ss:$48 sps:$4 sm:$0xff]   ;;  %v6555_v26 = vld [vmem:[#allocation5 + $0x5c0] ss:$48 sps:$4 sm:$0xff]  }
 0x24c   : > { %3347 = vmatprep.subr.bf16.mxu1 %v6492_v25  ;;  %v6558_v25 = vld [vmem:[#allocation5 + $0x8c0] ss:$48 sps:$4 sm:$0xff]  }
 0x24e   : > { %5810 = vmatpush3.bf16.msra.mxu0 %v6494_v28  ;;  %v6563_v28 = vld [vmem:[#allocation5 + $0x564] ss:$48 sps:$4 sm:$0xff]  }
 0x24f   : > { %3348 = vmatpush2.bf16.msra.mxu1 %v6490_v27  ;;  %5811 = vmatprep.subr.bf16.mxu0 %v6498_v2  ;;  %v6566_v27 = vld [vmem:[#allocation5 + $0x864] ss:$48 sps:$4 sm:$0xff]   ;;  %v6561_v2 = vld [vmem:[#allocation5 + $0x560] ss:$48 sps:$4 sm:$0xff]  }
 0x250   : > { %3349 = vmatprep.subr.bf16.mxu1 %v6497_v29  ;;  %v6564_v29 = vld [vmem:[#allocation5 + $0x860] ss:$48 sps:$4 sm:$0xff]  }
 0x252   : > { %5812 = vmatpush3.bf16.msra.mxu0 %v6499_v31  ;;  %v6569_v31 = vld [vmem:[#allocation5 + $0x504] ss:$48 sps:$4 sm:$0xff]  }
 0x253   : > { %3350 = vmatpush2.bf16.msra.mxu1 %v6495_v30  ;;  %5813 = vmatprep.subr.bf16.mxu0 %v6503_v34  ;;  %v6572_v30 = vld [vmem:[#allocation5 + $0x804] ss:$48 sps:$4 sm:$0xff]   ;;  %v6567_v34 = vld [vmem:[#allocation5 + $0x500] ss:$48 sps:$4 sm:$0xff]  }
 0x254   : > { %3351 = vmatprep.subr.bf16.mxu1 %v6502_v33  ;;  %v6570_v33 = vld [vmem:[#allocation5 + $0x800] ss:$48 sps:$4 sm:$0xff]  }
 0x256   : > { %5814 = vmatpush3.bf16.msra.mxu0 %v6504_v38  ;;  %v6575_v38 = vld [vmem:[#allocation5 + $0x4a4] ss:$48 sps:$4 sm:$0xff]  }
 0x257   : > { %3352 = vmatpush2.bf16.msra.mxu1 %v6500_v35  ;;  %5815 = vmatprep.subr.bf16.mxu0 %v6508_v40  ;;  %v6578_v35 = vld [vmem:[#allocation5 + $0x7a4] ss:$48 sps:$4 sm:$0xff]   ;;  %v6573_v40 = vld [vmem:[#allocation5 + $0x4a0] ss:$48 sps:$4 sm:$0xff]  }
 0x258   : > { %3353 = vmatprep.subr.bf16.mxu1 %v6507_v39  ;;  %v6576_v39 = vld [vmem:[#allocation5 + $0x7a0] ss:$48 sps:$4 sm:$0xff]  }
 0x25a   : > { %5816 = vmatpush3.bf16.msra.mxu0 %v6509_v45  ;;  %v6581_v45 = vld [vmem:[#allocation5 + $0x444] ss:$48 sps:$4 sm:$0xff]  }
 0x25b   : > { %3354 = vmatpush2.bf16.msra.mxu1 %v6505_v44  ;;  %5817 = vmatprep.subr.bf16.mxu0 %v6513_v46  ;;  %v6584_v44 = vld [vmem:[#allocation5 + $0x744] ss:$48 sps:$4 sm:$0xff]   ;;  %v6579_v46 = vld [vmem:[#allocation5 + $0x440] ss:$48 sps:$4 sm:$0xff]  }
 0x25c   : > { %3355 = vmatprep.subr.bf16.mxu1 %v6512_v56  ;;  %v6582_v56 = vld [vmem:[#allocation5 + $0x740] ss:$48 sps:$4 sm:$0xff]  }
 0x25e   : > { %5818 = vmatpush3.bf16.msra.mxu0 %v6514_v48  ;;  %v6587_v48 = vld [vmem:[#allocation5 + $0x3e4] ss:$48 sps:$4 sm:$0xff]  }
 0x25f   : > { %3356 = vmatpush2.bf16.msra.mxu1 %v6510_v47  ;;  %4044 = vmatprep.subr.bf16.mxu0 %v6518_v52  ;;  %v6590_v47 = vld [vmem:[#allocation5 + $0x6e4] ss:$48 sps:$4 sm:$0xff]  }
 0x260   : > { %5825 = vmatprep.subr.bf16.mxu1 %v6515_v50  ;;  %v6585_v50 = vld [vmem:[#allocation5 + $0x3e0] ss:$48 sps:$4 sm:$0xff]   ;;  %v6596_v52 = vld [vmem:[#allocation5 + $0x684] ss:$48 sps:$4 sm:$0xff]  }
 0x261   : > { %3399 = vmatmul.mubr.bf16.vlgmr.msra.gmra.mxu0 %v7280_v15  ;;  %v6548_v15 = vld [vmem:[#allocation5 + $0x84] ss:$48 sps:$4 sm:$0xff]  }
 0x262   : > { %3358 = vmatmul.mubr.bf16.vlgmr.msra.gmra.mxu1 %v7285_v55  ;;  %4045 = vmatpush1.bf16.msra.mxu0 %v6516_v57  ;;  %v6591_v57 = vld [vmem:[#allocation5 + $0x380] ss:$48 sps:$4 sm:$0xff]  }
 0x263   : > { %5826 = vmatpush3.bf16.msra.mxu1 %v6519_v54  ;;  %3438 = vmatprep.mubr.bf16.mxu1 %v7275_v41  ;;  %v6531_v41 = vld [vmem:[#allocation5 + $0x1a0] ss:$48 sps:$4 sm:$0xff]   ;;  %v6593_v54 = vld [vmem:[#allocation5 + $0x384] ss:$48 sps:$4 sm:$0xff]  }
 0x264   : > { %5827 = vmatprep.subr.bf16.mxu1 %v6520_v58  ;;  %4046 = vmatprep.subr.bf16.mxu0 %v6523_v59  ;;  %v6602_v58 = vld [vmem:[#allocation5 + $0x624] ss:$48 sps:$4 sm:$0xff]  }
 0x265   : > { %4076 = vmatprep.mubr.bf16.mxu0 %v7218_v53  ;;  %v6599_v59 = vld [vmem:[#allocation5 + $0x324] ss:$48 sps:$4 sm:$0xff]  }
 0x266   : > { %4047 = vmatpush1.bf16.msra.mxu0 %v6521_v60  ;;  %v6597_v60 = vld [vmem:[#allocation5 + $0x320] ss:$48 sps:$4 sm:$0xff]  }
 0x267   : > { %5828 = vmatpush3.bf16.msra.mxu1 %v6524_v51  ;;  %4048 = vmatprep.subr.bf16.mxu0 %v6528_v62  ;;  %v6600_v51 = vld [vmem:[#allocation5 + $0x620] ss:$48 sps:$4 sm:$0xff]   ;;  %v6629_v62 = vld [vmem:[#allocation5 + $0x8cc] ss:$48 sps:$4 sm:$0xff]  }
 0x268   : > { %5829 = vmatprep.subr.bf16.mxu1 %v6525_v61  ;;  %v6605_v61 = vld [vmem:[#allocation5 + $0x2cc] ss:$48 sps:$4 sm:$0xff]  }
 0x26a   : > { %4049 = vmatpush1.bf16.msra.mxu0 %v6526_v1  ;;  %v6608_v1 = vld [vmem:[#allocation5 + $0x26c] ss:$48 sps:$4 sm:$0xff]  }
 0x26b   : > { %5830 = vmatpush3.bf16.msra.mxu1 %v6529_v63  ;;  %4050 = vmatprep.subr.bf16.mxu0 %v6533_v4  ;;  %v6603_v63 = vld [vmem:[#allocation5 + $0x2c8] ss:$48 sps:$4 sm:$0xff]   ;;  %v6635_v4 = vld [vmem:[#allocation5 + $0x86c] ss:$48 sps:$4 sm:$0xff]  }
 0x26c   : > { %5831 = vmatprep.subr.bf16.mxu1 %v6530_v3  ;;  %v6627_v3 = vld [vmem:[#allocation5 + $0x8c8] ss:$48 sps:$4 sm:$0xff]  }
 0x26e   : > { %4051 = vmatpush1.bf16.msra.mxu0 %v6531_v41  ;;  %v6606_v41 = vld [vmem:[#allocation5 + $0x268] ss:$48 sps:$4 sm:$0xff]  }
 0x26f   : > { %5832 = vmatpush3.bf16.msra.mxu1 %v6534_v37  ;;  %4052 = vmatprep.subr.bf16.mxu0 %v6538_v6  ;;  %v6611_v6 = vld [vmem:[#allocation5 + $0x20c] ss:$48 sps:$4 sm:$0xff]  }
 0x270   : > { %5833 = vmatprep.subr.bf16.mxu1 %v6535_v5 }
 0x272   : > { %4053 = vmatpush1.bf16.msra.mxu0 %v6536_v8  ;;  %v6641_v8 = vld [vmem:[#allocation5 + $0x80c] ss:$48 sps:$4 sm:$0xff]  }
 0x273   : > { %5834 = vmatpush3.bf16.msra.mxu1 %v6539_v7  ;;  %4054 = vmatprep.subr.bf16.mxu0 %v6543_v11  ;;  %v6633_v7 = vld [vmem:[#allocation5 + $0x868] ss:$48 sps:$4 sm:$0xff]  }
 0x274   : > { %5835 = vmatprep.subr.bf16.mxu1 %v6540_v10  ;;  %v6609_v11 = vld [vmem:[#allocation5 + $0x208] ss:$48 sps:$4 sm:$0xff]  }
 0x276   : > { %4055 = vmatpush1.bf16.msra.mxu0 %v6541_v13  ;;  %v6614_v13 = vld [vmem:[#allocation5 + $0x1ac] ss:$48 sps:$4 sm:$0xff]  }
 0x277   : > { %5836 = vmatpush3.bf16.msra.mxu1 %v6544_v12  ;;  %4056 = vmatprep.subr.bf16.mxu0 %v6548_v15  ;;  %v6647_v15 = vld [vmem:[#allocation5 + $0x7ac] ss:$48 sps:$4 sm:$0xff]  }
 0x278   : > { %5837 = vmatprep.subr.bf16.mxu1 %v6545_v14  ;;  %v6639_v14 = vld [vmem:[#allocation5 + $0x808] ss:$48 sps:$4 sm:$0xff]  }
 0x27a   : > { %4057 = vmatpush1.bf16.msra.mxu0 %v6546_v17  ;;  %v6617_v17 = vld [vmem:[#allocation5 + $0x14c] ss:$48 sps:$4 sm:$0xff]  }
 0x27b   : > { %5838 = vmatpush3.bf16.msra.mxu1 %v6549_v16  ;;  %4058 = vmatprep.subr.bf16.mxu0 %v6553_v32  ;;  %v6612_v16 = vld [vmem:[#allocation5 + $0x1a8] ss:$48 sps:$4 sm:$0xff]  }
 0x27c   : > { %5839 = vmatprep.subr.bf16.mxu1 %v6550_v19  ;;  %v6645_v19 = vld [vmem:[#allocation5 + $0x7a8] ss:$48 sps:$4 sm:$0xff]  }
 0x27d   : > { %v6615_v32 = vld [vmem:[#allocation5 + $0x148] ss:$48 sps:$4 sm:$0xff]  }
 0x27e   : > { %4059 = vmatpush1.bf16.msra.mxu0 %v6551_v21  ;;  %v6659_v21 = vld [vmem:[#allocation5 + $0x6ec] ss:$48 sps:$4 sm:$0xff]  }
 0x27f   : > { %5840 = vmatpush3.bf16.msra.mxu1 %v6554_v20  ;;  %4060 = vmatprep.subr.bf16.mxu0 %v6557_v24  ;;  %v6651_v20 = vld [vmem:[#allocation5 + $0x748] ss:$48 sps:$4 sm:$0xff]   ;;  %v6623_v24 = vld [vmem:[#allocation5 + $0x8c] ss:$48 sps:$4 sm:$0xff]  }
 0x280   : > { %4085 = vmatprep.subr.bf16.mxu1 %v6560_v22  ;;  %v6618_v22 = vld [vmem:[#allocation5 + $0xe8] ss:$48 sps:$4 sm:$0xff]  }
 0x282   : > { %3439 = vmatmul.mubr.bf16.vlgmr.msra.gmra.mxu1 %v7285_v55  ;;  %4061 = vmatpush2.bf16.msra.mxu0 %v6555_v26  ;;  %v6594_v55 = vld [vmem:[#allocation5 + $0x680] ss:$48 sps:$4 sm:$0xff]   ;;  %v6665_v26 = vld [vmem:[#allocation5 + $0x68c] ss:$48 sps:$4 sm:$0xff]  }
 0x283   : > { %4086 = vmatpush1.bf16.msra.mxu1 %v6558_v25  ;;  %4117 = vmatprep.mubr.bf16.mxu1 %v7018_v0  ;;  %v6657_v25 = vld [vmem:[#allocation5 + $0x6e8] ss:$48 sps:$4 sm:$0xff]  }
 0x284   : > { %4087 = vmatprep.subr.bf16.mxu1 %v6566_v27  ;;  %4062 = vmatprep.subr.bf16.mxu0 %v6563_v28  ;;  %v6621_v27 = vld [vmem:[#allocation5 + $0x88] ss:$48 sps:$4 sm:$0xff]   ;;  %v6626_v28 = vld [vmem:[#allocation5 + $0x2c] ss:$48 sps:$4 sm:$0xff]  }
 0x286   : > { %4063 = vmatpush2.bf16.msra.mxu0 %v6561_v2  ;;  %v6671_v2 = vld [vmem:[#allocation5 + $0x62c] ss:$48 sps:$4 sm:$0xff]  }
 0x287   : > { %4088 = vmatpush1.bf16.msra.mxu1 %v6564_v29  ;;  %4064 = vmatprep.subr.bf16.mxu0 %v6569_v31  ;;  %v6663_v29 = vld [vmem:[#allocation5 + $0x688] ss:$48 sps:$4 sm:$0xff]   ;;  %v6632_v31 = vld [vmem:[#allocation5 + $0x5cc] ss:$48 sps:$4 sm:$0xff]  }
 0x288   : > { %4089 = vmatprep.subr.bf16.mxu1 %v6572_v30  ;;  %v6624_v30 = vld [vmem:[#allocation5 + $0x28] ss:$48 sps:$4 sm:$0xff]  }
 0x28a   : > { %4065 = vmatpush2.bf16.msra.mxu0 %v6567_v34  ;;  %v6677_v34 = vld [vmem:[#allocation8 + $0x6ac] ss:$12 sps:$4 sm:$0xff]  }
 0x28b   : > { %4090 = vmatpush1.bf16.msra.mxu1 %v6570_v33  ;;  %4066 = vmatprep.subr.bf16.mxu0 %v6575_v38  ;;  %v6669_v33 = vld [vmem:[#allocation5 + $0x628] ss:$48 sps:$4 sm:$0xff]   ;;  %v6638_v38 = vld [vmem:[#allocation5 + $0x56c] ss:$48 sps:$4 sm:$0xff]  }
 0x28c   : > { %4091 = vmatprep.subr.bf16.mxu1 %v6578_v35  ;;  %v6630_v35 = vld [vmem:[#allocation5 + $0x5c8] ss:$48 sps:$4 sm:$0xff]  }
 0x28e   : > { %4067 = vmatpush2.bf16.msra.mxu0 %v6573_v40  ;;  %v6680_v40 = vld [vmem:[#allocation8 + $0x694] ss:$12 sps:$4 sm:$0xff]  }
 0x28f   : > { %4092 = vmatpush1.bf16.msra.mxu1 %v6576_v39  ;;  %4068 = vmatprep.subr.bf16.mxu0 %v6581_v45  ;;  %v6675_v39 = vld [vmem:[#allocation8 + $0x6a8] ss:$12 sps:$4 sm:$0xff]  }
 0x290   : > { %4093 = vmatprep.subr.bf16.mxu1 %v6584_v44 }
 0x292   : > { %4069 = vmatpush2.bf16.msra.mxu0 %v6579_v46  ;;  %v6636_v46 = vld [vmem:[#allocation5 + $0x568] ss:$48 sps:$4 sm:$0xff]  }
 0x293   : > { %4094 = vmatpush1.bf16.msra.mxu1 %v6582_v56  ;;  %4070 = vmatprep.subr.bf16.mxu0 %v6587_v48 }
 0x294   : > { %4095 = vmatprep.subr.bf16.mxu1 %v6590_v47 }
 0x296   : > { %4071 = vmatpush2.bf16.msra.mxu0 %v6585_v50  ;;  %v6678_v50 = vld [vmem:[#allocation8 + $0x690] ss:$12 sps:$4 sm:$0xff]  }
 0x297   : > { %4096 = vmatpush1.bf16.msra.mxu1 %v6588_v49  ;;  %4072 = vmatprep.subr.bf16.mxu0 %v6593_v54  ;;  %v6644_v49 = vld [vmem:[#allocation5 + $0x50c] ss:$48 sps:$4 sm:$0xff]  }
 0x298   : > { %4097 = vmatprep.subr.bf16.mxu1 %v6596_v52 }
 0x29a   : > { %4073 = vmatpush2.bf16.msra.mxu0 %v6591_v57 }
 0x29b   : > { %4098 = vmatpush1.bf16.msra.mxu1 %v6594_v55  ;;  %4074 = vmatprep.subr.bf16.mxu0 %v6599_v59  ;;  %v6683_v55 = vld [vmem:[#allocation8 + $0x67c] ss:$12 sps:$4 sm:$0xff]  }
 0x29c   : > { %4099 = vmatprep.subr.bf16.mxu1 %v6602_v58  ;;  %v6642_v59 = vld [vmem:[#allocation5 + $0x508] ss:$48 sps:$4 sm:$0xff]  }
 0x29e   : > { %4075 = vmatpush2.bf16.msra.mxu0 %v6597_v60 }
 0x29f   : > { %4100 = vmatpush1.bf16.msra.mxu1 %v6600_v51  ;;  %4167 = vmatprep.subr.bf16.mxu0 %v6629_v62  ;;  %v6686_v62 = vld [vmem:[#allocation8 + $0x664] ss:$12 sps:$4 sm:$0xff]  }
 0x2a0   : > { %4126 = vmatprep.subr.bf16.mxu1 %v6605_v61  ;;  %v6681_v61 = vld [vmem:[#allocation8 + $0x678] ss:$12 sps:$4 sm:$0xff]  }
 0x2a1   : > { %v7294_v37 = vpop.f32.mrf.mxu0  ;;  %4077 = vmatmul.mubr.bf16.vlgmr.msra.gmra.mxu0 %v7223_v9 }
 0x2a2   : > { %4118 = vmatmul.mubr.bf16.vlgmr.msra.gmra.mxu1 %v7214_v36  ;;  %4168 = vmatpush1.bf16.msra.mxu0 %v6627_v3  ;;  %v6684_v3 = vld [vmem:[#allocation8 + $0x660] ss:$12 sps:$4 sm:$0xff]  }
 0x2a3   : > { %4127 = vmatpush1.bf16.msra.mxu1 %v6603_v63  ;;  %v7297_v5 = vpop.f32.mrf.mxu0  ;;  %4169 = vmatprep.subr.bf16.mxu0 %v6635_v4  ;;  %v6648_v63 = vld [vmem:[#allocation5 + $0x4a8] ss:$48 sps:$4 sm:$0xff]  }
 0x2a4   : > { %4128 = vmatprep.subr.bf16.mxu1 %v6608_v1  ;;  %4199 = vmatprep.mubr.bf16.mxu0 %v7018_v0  ;;  %v6653_v0 = vld [vmem:[#allocation5 + $0x74c] ss:$48 sps:$4 sm:$0xff]   ;;  %v6689_v4 = vld [vmem:[#allocation8 + $0x64c] ss:$12 sps:$4 sm:$0xff]  }
 0x2a5   : > { %v2648_v10 = vpop.f32.mrf.mxu0  ;;  %4158 = vmatprep.mubr.bf16.mxu1 %v7218_v53  ;;  %v6620_v53 = vld [vmem:[#allocation5 + $0xec] ss:$48 sps:$4 sm:$0xff]  }
 0x2a6   : > { %4170 = vmatpush1.bf16.msra.mxu0 %v6633_v7  ;;  %v6656_v1 = vld [vmem:[#allocation5 + $0x44c] ss:$48 sps:$4 sm:$0xff]   ;;  %v6660_v7 = vld [vmem:[#allocation5 + $0x3e8] ss:$48 sps:$4 sm:$0xff]  }
 0x2a7   : > { %4129 = vmatpush1.bf16.msra.mxu1 %v6606_v41  ;;  %v2649_v12 = vpop.f32.mrf.mxu0  ;;  %4171 = vmatprep.subr.bf16.mxu0 %v6641_v8  ;;  %v6662_v41 = vld [vmem:[#allocation5 + $0x3ec] ss:$48 sps:$4 sm:$0xff]  }
 0x2a8   : > { %4130 = vmatprep.subr.bf16.mxu1 %v6611_v6  ;;  %v6692_v6 = vld [vmem:[#allocation8 + $0x634] ss:$12 sps:$4 sm:$0xff]   ;;  %v6690_v10 = vld [vmem:[#allocation8 + $0x630] ss:$12 sps:$4 sm:$0xff]  }
 0x2a9   : > { %v6668_v8 = vld [vmem:[#allocation5 + $0x38c] ss:$48 sps:$4 sm:$0xff]   ;;  %v6666_v12 = vld [vmem:[#allocation5 + $0x388] ss:$48 sps:$4 sm:$0xff]  }
 0x2aa   : > { %4172 = vmatpush1.bf16.msra.mxu0 %v6639_v14  ;;  %v6693_v14 = vld [vmem:[#allocation8 + $0x618] ss:$12 sps:$4 sm:$0xff]  }
 0x2ab   : > { %4131 = vmatpush1.bf16.msra.mxu1 %v6609_v11  ;;  %4173 = vmatprep.subr.bf16.mxu0 %v6647_v15  ;;  %v6695_v11 = vld [vmem:[#allocation8 + $0x61c] ss:$12 sps:$4 sm:$0xff]   ;;  %v6698_v15 = vld [vmem:[#allocation8 + $0x604] ss:$12 sps:$4 sm:$0xff]  }
 0x2ac   : > { %4132 = vmatprep.subr.bf16.mxu1 %v6614_v13  ;;  %v6674_v13 = vld [vmem:[#allocation5 + $0x32c] ss:$48 sps:$4 sm:$0xff]  }
 0x2ae   : > { %4174 = vmatpush1.bf16.msra.mxu0 %v6645_v19  ;;  %v6701_v19 = vld [vmem:[#allocation8 + $0x76c] ss:$12 sps:$4 sm:$0xff]  }
 0x2af   : > { %4133 = vmatpush1.bf16.msra.mxu1 %v6612_v16  ;;  %4175 = vmatprep.subr.bf16.mxu0 %v6653_v0  ;;  %v6672_v16 = vld [vmem:[#allocation5 + $0x328] ss:$48 sps:$4 sm:$0xff]   ;;  %v6699_v0 = vld [vmem:[#allocation8 + $0x768] ss:$12 sps:$4 sm:$0xff]  }
 0x2b0   : > { %4134 = vmatprep.subr.bf16.mxu1 %v6617_v17  ;;  %v6696_v17 = vld [vmem:[#allocation8 + $0x600] ss:$12 sps:$4 sm:$0xff]  }
 0x2b2   : > { %4176 = vmatpush1.bf16.msra.mxu0 %v6651_v20 }
 0x2b3   : > { %4135 = vmatpush1.bf16.msra.mxu1 %v6615_v32  ;;  %4177 = vmatprep.subr.bf16.mxu0 %v6659_v21  ;;  %v6704_v32 = vld [vmem:[#allocation8 + $0x754] ss:$12 sps:$4 sm:$0xff]   ;;  %v6702_v21 = vld [vmem:[#allocation8 + $0x750] ss:$12 sps:$4 sm:$0xff]  }
 0x2b4   : > { %4136 = vmatprep.subr.bf16.mxu1 %v6620_v53 }
 0x2b6   : > { %4178 = vmatpush1.bf16.msra.mxu0 %v6657_v25 }
 0x2b7   : > { %4137 = vmatpush1.bf16.msra.mxu1 %v6618_v22  ;;  %4179 = vmatprep.subr.bf16.mxu0 %v6665_v26 }
 0x2b8   : > { %4138 = vmatprep.subr.bf16.mxu1 %v6623_v24  ;;  %v6707_v24 = vld [vmem:[#allocation8 + $0x73c] ss:$12 sps:$4 sm:$0xff]  }
 0x2ba   : > { %4180 = vmatpush1.bf16.msra.mxu0 %v6663_v29  ;;  %v6710_v29 = vld [vmem:[#allocation8 + $0x724] ss:$12 sps:$4 sm:$0xff]  }
 0x2bb   : > { %4139 = vmatpush1.bf16.msra.mxu1 %v6621_v27  ;;  %4181 = vmatprep.subr.bf16.mxu0 %v6671_v2  ;;  %v6708_v2 = vld [vmem:[#allocation8 + $0x720] ss:$12 sps:$4 sm:$0xff]  }
 0x2bc   : > { %4140 = vmatprep.subr.bf16.mxu1 %v6626_v28  ;;  %v6705_v28 = vld [vmem:[#allocation8 + $0x738] ss:$12 sps:$4 sm:$0xff]  }
 0x2be   : > { %4182 = vmatpush1.bf16.msra.mxu0 %v6669_v33  ;;  %v6711_v33 = vld [vmem:[#allocation8 + $0x708] ss:$12 sps:$4 sm:$0xff]  }
 0x2bf   : > { %4141 = vmatpush1.bf16.msra.mxu1 %v6624_v30  ;;  %4856 = vmatprep.subr.bf16.mxu0 %v6677_v34  ;;  %v6725_v30 = vld [vmem:[#allocation8 + $0x82c] ss:$12 sps:$4 sm:$0xff]   ;;  %v6728_v34 = vld [vmem:[#allocation8 + $0x810] ss:$12 sps:$4 sm:$0xff]  }
 0x2c0   : > { %4142 = vmatprep.subr.bf16.mxu1 %v6632_v31  ;;  %v6723_v31 = vld [vmem:[#allocation8 + $0x828] ss:$12 sps:$4 sm:$0xff]  }
 0x2c1   : > { %v5775_v44 = vpop.f32.mrf.mxu0  ;;  %4200 = vmatmul.mubr.bf16.vlgmr.msra.gmra.mxu0 %v7214_v36  ;;  %v6650_v36 = vld [vmem:[#allocation5 + $0x4ac] ss:$48 sps:$4 sm:$0xff]  }
 0x2c2   : > { %v2685_v45 = vpop.f32.mrf.mxu1  ;;  %4857 = vmatpush1.bf16.msra.mxu0 %v6675_v39  ;;  %v6714_v39 = vld [vmem:[#allocation8 + $0x6f0] ss:$12 sps:$4 sm:$0xff]  }
 0x2c3   : > { %v7302_v56 = vadd.f32 %v2685_v45, %v7294_v37  ;;  %4143 = vmatpush2.bf16.msra.mxu1 %v6630_v35  ;;  %v5776_v47 = vpop.f32.mrf.mxu0  ;;  %4858 = vmatprep.subr.bf16.mxu0 %v6680_v40  ;;  %v6654_v37 = vld [vmem:[#allocation5 + $0x448] ss:$48 sps:$4 sm:$0xff]   ;;  %v6730_v35 = vld [vmem:[#allocation8 + $0x814] ss:$12 sps:$4 sm:$0xff]   ;;  %v6733_v40 = vld [vmem:[#allocation8 + $0x7f8] ss:$12 sps:$4 sm:$0xff]  }
 0x2c4   : > { %v2687_v48 = vpop.f32.mrf.mxu1  ;;  %4144 = vmatprep.subr.bf16.mxu1 %v6638_v38  ;;  %v7305_v52 = vadd.f32 %v5776_v47, %v5775_v44  ;;  %v6716_v38 = vld [vmem:[#allocation8 + $0x6f4] ss:$12 sps:$4 sm:$0xff]   ;;  %v6735_v44 = vld [vmem:[#allocation8 + $0x7fc] ss:$12 sps:$4 sm:$0xff]  }
 0x2c5   : > { %v7308_v54 = vadd.f32 %v2687_v48, %v7297_v5  ;;  %v5778_v57 = vpop.f32.mrf.mxu0  ;;  %v6687_v5 = vld [vmem:[#allocation8 + $0x648] ss:$12 sps:$4 sm:$0xff]   ;;  %v6738_v47 = vld [vmem:[#allocation8 + $0x7e0] ss:$12 sps:$4 sm:$0xff]   ;;  %v6740_v48 = vld [vmem:[#allocation8 + $0x7e4] ss:$12 sps:$4 sm:$0xff]  }
 0x2c6   : > { %v2689_v58 = vpop.f32.mrf.mxu1  ;;  %4859 = vmatpush1.bf16.msra.mxu0 %v6678_v50  ;;  %v6719_v45 = vld [vmem:[#allocation8 + $0x6dc] ss:$12 sps:$4 sm:$0xff]   ;;  %v6720_v50 = vld [vmem:[#allocation8 + $0x6c0] ss:$12 sps:$4 sm:$0xff]  }
 0x2c7   : > { %4145 = vmatpush2.bf16.msra.mxu1 %v6636_v46  ;;  %v5779_v51 = vpop.f32.mrf.mxu0  ;;  %4860 = vmatprep.subr.bf16.mxu0 %v6683_v55  ;;  %v6717_v46 = vld [vmem:[#allocation8 + $0x6d8] ss:$12 sps:$4 sm:$0xff]   ;;  %v6726_v57 = vld [vmem:[#allocation8 + $0x770] ss:$12 sps:$4 sm:$0xff]  }
 0x2c8   : > { %v2690_v60 = vpop.f32.mrf.mxu1  ;;  %4146 = vmatprep.subr.bf16.mxu1 %v6644_v49  ;;  %v6722_v49 = vld [vmem:[#allocation8 + $0x6c4] ss:$12 sps:$4 sm:$0xff]   ;;  %v6745_v55 = vld [vmem:[#allocation8 + $0x7cc] ss:$12 sps:$4 sm:$0xff]  }
 0x2c9   : > { %v6748_v58 = vld [vmem:[#allocation8 + $0x7b0] ss:$12 sps:$4 sm:$0xff]  }
 0x2ca   : > { %4861 = vmatpush1.bf16.msra.mxu0 %v6681_v61  ;;  %v6753_v61 = vld [vmem:[#allocation8 + $0x798] ss:$12 sps:$4 sm:$0xff]  }
 0x2cb   : > { %4147 = vmatpush2.bf16.msra.mxu1 %v6642_v59  ;;  %4862 = vmatprep.subr.bf16.mxu0 %v6686_v62  ;;  %v6750_v59 = vld [vmem:[#allocation8 + $0x7b4] ss:$12 sps:$4 sm:$0xff]   ;;  %v6755_v62 = vld [vmem:[#allocation8 + $0x79c] ss:$12 sps:$4 sm:$0xff]  }
 0x2cc   : > { %4148 = vmatprep.subr.bf16.mxu1 %v6650_v36 }
 0x2ce   : > { %4863 = vmatpush1.bf16.msra.mxu0 %v6684_v3 }
 0x2cf   : > { %4149 = vmatpush2.bf16.msra.mxu1 %v6648_v63  ;;  %4864 = vmatprep.subr.bf16.mxu0 %v6689_v4  ;;  %v6758_v4 = vld [vmem:[#allocation8 + $0x780] ss:$12 sps:$4 sm:$0xff]  }
 0x2d0   : > { %4150 = vmatprep.subr.bf16.mxu1 %v6656_v1 }
 0x2d2   : > { %4865 = vmatpush1.bf16.msra.mxu0 %v6687_v5  ;;  %v6765_v5 = vld [vmem:[#allocation8 + $0x8ec] ss:$12 sps:$4 sm:$0xff]  }
 0x2d3   : > { %4151 = vmatpush2.bf16.msra.mxu1 %v6654_v37  ;;  %4866 = vmatprep.subr.bf16.mxu0 %v6692_v6  ;;  %v6760_v37 = vld [vmem:[#allocation8 + $0x784] ss:$12 sps:$4 sm:$0xff]  }
 0x2d4   : > { %4152 = vmatprep.subr.bf16.mxu1 %v6662_v41  ;;  %v6763_v41 = vld [vmem:[#allocation8 + $0x8e8] ss:$12 sps:$4 sm:$0xff]   ;;  %v6766_v6 = vld [vmem:[#allocation8 + $0x8d0] ss:$12 sps:$4 sm:$0xff]  }
 0x2d6   : > { %4867 = vmatpush1.bf16.msra.mxu0 %v6690_v10  ;;  %v6772_v10 = vld [vmem:[#allocation8 + $0x8a0] ss:$12 sps:$4 sm:$0xff]  }
 0x2d7   : > { %4153 = vmatpush2.bf16.msra.mxu1 %v6660_v7  ;;  %4868 = vmatprep.subr.bf16.mxu0 %v6695_v11  ;;  %v6771_v7 = vld [vmem:[#allocation8 + $0x8bc] ss:$12 sps:$4 sm:$0xff]   ;;  %v6777_v11 = vld [vmem:[#allocation8 + $0x88c] ss:$12 sps:$4 sm:$0xff]  }
 0x2d8   : > { %4154 = vmatprep.subr.bf16.mxu1 %v6668_v8  ;;  %v6769_v8 = vld [vmem:[#allocation8 + $0x8b8] ss:$12 sps:$4 sm:$0xff]  }
 0x2da   : > { %4869 = vmatpush1.bf16.msra.mxu0 %v6693_v14  ;;  %v6778_v14 = vld [vmem:[#allocation8 + $0x870] ss:$12 sps:$4 sm:$0xff]  }
 0x2db   : > { %4155 = vmatpush2.bf16.msra.mxu1 %v6666_v12  ;;  %4870 = vmatprep.subr.bf16.mxu0 %v6698_v15  ;;  %v6775_v12 = vld [vmem:[#allocation8 + $0x888] ss:$12 sps:$4 sm:$0xff]  }
 0x2dc   : > { %4156 = vmatprep.subr.bf16.mxu1 %v6674_v13  ;;  %v6780_v13 = vld [vmem:[#allocation8 + $0x874] ss:$12 sps:$4 sm:$0xff]  }
 0x2de   : > { %4871 = vmatpush1.bf16.msra.mxu0 %v6696_v17 }
 0x2df   : > { %4157 = vmatpush2.bf16.msra.mxu1 %v6672_v16  ;;  %4872 = vmatprep.subr.bf16.mxu0 %v6701_v19 }
 0x2e0   : > { %4897 = vmatprep.subr.bf16.mxu1 %v6725_v30  ;;  %v6787_v30 = vld [vmem:[#allocation8 + $0x8f0] ss:$12 sps:$4 sm:$0xff]  }
 0x2e2   : > { %v5797_v53 = vpop.f32.mrf.mxu1  ;;  %4159 = vmatmul.mubr.bf16.vlgmr.msra.gmra.mxu1 %v7223_v9  ;;  %4873 = vmatpush2.bf16.msra.mxu0 %v6699_v0  ;;  %v6713_v9 = vld [vmem:[#allocation8 + $0x70c] ss:$12 sps:$4 sm:$0xff]  }
 0x2e3   : > { %4874 = vmatprep.subr.bf16.mxu0 %v6704_v32  ;;  %4898 = vmatpush1.bf16.msra.mxu1 %v6723_v31 }
 0x2e4   : > { %v5798_v20 = vpop.f32.mrf.mxu1  ;;  %4899 = vmatprep.subr.bf16.mxu1 %v6730_v35 }
 0x2e5   : > { %v5799_v22 = vadd.f32 %v5798_v20, %v5797_v53  ;;  %v6783_v20 = vld [vmem:[#allocation8 + $0x85c] ss:$12 sps:$4 sm:$0xff]  }
 0x2e6   : > { %v5800_v25 = vpop.f32.mrf.mxu1  ;;  %4875 = vmatpush2.bf16.msra.mxu0 %v6702_v21 }
 0x2e7   : > { %v7312_v26 = vadd.f32 %v5799_v22, %v7305_v52  ;;  %4876 = vmatprep.subr.bf16.mxu0 %v6707_v24  ;;  %4900 = vmatpush1.bf16.msra.mxu1 %v6728_v34  ;;  %v6743_v52 = vld [vmem:[#allocation8 + $0x7c8] ss:$12 sps:$4 sm:$0xff]   ;;  %v6781_v24 = vld [vmem:[#allocation8 + $0x858] ss:$12 sps:$4 sm:$0xff]  }
 0x2e8   : > { %v5801_v27 = vpop.f32.mrf.mxu1  ;;  %4901 = vmatprep.subr.bf16.mxu1 %v6735_v44 }
 0x2ea   : > { %4877 = vmatpush2.bf16.msra.mxu0 %v6705_v28 }
 0x2eb   : > { %4878 = vmatprep.subr.bf16.mxu0 %v6710_v29  ;;  %4902 = vmatpush1.bf16.msra.mxu1 %v6733_v40  ;;  %v6786_v29 = vld [vmem:[#allocation8 + $0x844] ss:$12 sps:$4 sm:$0xff]  }
 0x2ec   : > { %4903 = vmatprep.subr.bf16.mxu1 %v6740_v48 }
 0x2ee   : > { %4879 = vmatpush2.bf16.msra.mxu0 %v6708_v2  ;;  %v6784_v2 = vld [vmem:[#allocation8 + $0x840] ss:$12 sps:$4 sm:$0xff]  }
 0x2ef   : > { %4880 = vmatprep.subr.bf16.mxu0 %v6713_v9  ;;  %4904 = vmatpush1.bf16.msra.mxu1 %v6738_v47 }
 0x2f0   : > { %4905 = vmatprep.subr.bf16.mxu1 %v6745_v55 }
 0x2f2   : > { %4881 = vmatpush2.bf16.msra.mxu0 %v6711_v33 }
 0x2f3   : > { %4882 = vmatprep.subr.bf16.mxu0 %v6716_v38  ;;  %4906 = vmatpush1.bf16.msra.mxu1 %v6743_v52 }
 0x2f4   : > { %4907 = vmatprep.subr.bf16.mxu1 %v6750_v59 }
 0x2f6   : > { %4883 = vmatpush2.bf16.msra.mxu0 %v6714_v39  ;;  %v7323_v39 = vld [vmem:[#allocation7 + $0x8] sm:$0xf] }
 0x2f7   : > { %4884 = vmatprep.subr.bf16.mxu0 %v6719_v45  ;;  %4908 = vmatpush1.bf16.msra.mxu1 %v6748_v58  ;;  %v3551_v44 = vrot.slane %v7323_v39, %v7243_v23 }
 0x2f8   : > { %4909 = vmatprep.subr.bf16.mxu1 %v6755_v62 }
 0x2fa   : > { %4885 = vmatpush2.bf16.msra.mxu0 %v6717_v46 }
 0x2fb   : > { %4886 = vmatprep.subr.bf16.mxu0 %v6722_v49  ;;  %4910 = vmatpush1.bf16.msra.mxu1 %v6753_v61  ;;  %v6727_v61 = vld [vmem:[#allocation8 + $0x6b0] ss:$12 sps:$4 sm:$0xff]  }
 0x2fc   : > { %4911 = vmatprep.subr.bf16.mxu1 %v6760_v37  ;;  %v6741_v37 = vld [vmem:[#allocation8 + $0x728] ss:$12 sps:$4 sm:$0xff]  }
 0x2fe   : > { %4887 = vmatpush2.bf16.msra.mxu0 %v6720_v50 }
 0x2ff   : > { %5847 = vmatprep.subr.bf16.mxu0 %v6726_v57  ;;  %4912 = vmatpush1.bf16.msra.mxu1 %v6758_v4  ;;  %v6737_v4 = vld [vmem:[#allocation8 + $0x680] ss:$12 sps:$4 sm:$0xff]  }
 0x300   : > { %4913 = vmatprep.subr.bf16.mxu1 %v6765_v5  ;;  %v6746_v5 = vld [vmem:[#allocation8 + $0x710] ss:$12 sps:$4 sm:$0xff]  }
 0x301   : > { %v3318_v51 = vpop.f32.mrf.mxu0 }
 0x302   : > { %v3319_v60 = vadd.f32 %v3318_v51, %v7302_v56  ;;  %v6768_v56 = vld [vmem:[#allocation8 + $0x8d4] ss:$12 sps:$4 sm:$0xff]  }
 0x303   : > { %v3320_v36 = vpop.f32.mrf.mxu0  ;;  %4914 = vmatpush2.bf16.msra.mxu1 %v6763_v41  ;;  %v6742_v41 = vld [vmem:[#allocation8 + $0x668] ss:$12 sps:$4 sm:$0xff]  }
 0x304   : > { %v3321_v63 = vadd.f32 %v3320_v36, %v7308_v54  ;;  %4915 = vmatprep.subr.bf16.mxu1 %v6768_v56  ;;  %v6774_v54 = vld [vmem:[#allocation8 + $0x8a4] ss:$12 sps:$4 sm:$0xff]  }
 0x305   : > { %v3322_v1 = vpop.f32.mrf.mxu0  ;;  %v6751_v56 = vld [vmem:[#allocation8 + $0x6f8] ss:$12 sps:$4 sm:$0xff]  }
 0x306   : > { %v6732_v1 = vld [vmem:[#allocation8 + $0x698] ss:$12 sps:$4 sm:$0xff]  }
 0x307   : > { %v3323_v3 = vpop.f32.mrf.mxu0  ;;  %4916 = vmatpush2.bf16.msra.mxu1 %v6766_v6  ;;  %v6747_v6 = vld [vmem:[#allocation8 + $0x650] ss:$12 sps:$4 sm:$0xff]  }
 0x308   : > { %4917 = vmatprep.subr.bf16.mxu1 %v6771_v7  ;;  %v6736_v3 = vld [vmem:[#allocation8 + $0x740] ss:$12 sps:$4 sm:$0xff]   ;;  %v6752_v7 = vld [vmem:[#allocation8 + $0x638] ss:$12 sps:$4 sm:$0xff]  }
 0x30b   : > { %4918 = vmatpush2.bf16.msra.mxu1 %v6769_v8  ;;  %v6756_v8 = vld [vmem:[#allocation8 + $0x6e0] ss:$12 sps:$4 sm:$0xff]  }
 0x30c   : > { %4919 = vmatprep.subr.bf16.mxu1 %v6774_v54 }
 0x30f   : > { %4920 = vmatpush2.bf16.msra.mxu1 %v6772_v10  ;;  %v6757_v10 = vld [vmem:[#allocation8 + $0x620] ss:$12 sps:$4 sm:$0xff]  }
 0x310   : > { %4921 = vmatprep.subr.bf16.mxu1 %v6777_v11  ;;  %v6761_v11 = vld [vmem:[#allocation8 + $0x6c8] ss:$12 sps:$4 sm:$0xff]  }
 0x313   : > { %4922 = vmatpush2.bf16.msra.mxu1 %v6775_v12 }
 0x314   : > { %4923 = vmatprep.subr.bf16.mxu1 %v6780_v13 }
 0x317   : > { %4924 = vmatpush2.bf16.msra.mxu1 %v6778_v14  ;;  %v6762_v14 = vld [vmem:[#allocation8 + $0x608] ss:$12 sps:$4 sm:$0xff]  }
 0x318   : > { %4925 = vmatprep.subr.bf16.mxu1 %v6783_v20 }
 0x31b   : > { %4926 = vmatpush2.bf16.msra.mxu1 %v6781_v24 }
 0x31c   : > { %4927 = vmatprep.subr.bf16.mxu1 %v6786_v29 }
 0x31f   : > { %4928 = vmatpush2.bf16.msra.mxu1 %v6784_v2 }
 0x320   : > { %5869 = vmatprep.subr.bf16.mxu1 %v6787_v30  ;;  %v6788_v30 = vld [vmem:[#allocation8 + $0x830] ss:$12 sps:$4 sm:$0xff]  }
 0x321   : > { %v5819_v16 = vpop.f32.mrf.mxu0 }
 0x322   : > { %v3359_v15 = vpop.f32.mrf.mxu1 }
 0x323   : > { %v7316_v17 = vadd.f32 %v3359_v15, %v3319_v60  ;;  %v5820_v0 = vpop.f32.mrf.mxu0 }
 0x324   : > { %v3361_v19 = vpop.f32.mrf.mxu1  ;;  %v5821_v53 = vadd.f32 %v5820_v0, %v5819_v16  ;;  %v3555_v16 = vrot.slane %v7323_v39, %v7253_v42 }
 0x325   : > { %v7318_v32 = vadd.f32 %v3361_v19, %v3321_v63  ;;  %v5822_v22 = vpop.f32.mrf.mxu0  ;;  %v6731_v63 = vld [vmem:[#allocation8 + $0x758] ss:$12 sps:$4 sm:$0xff]   ;;  %v3559_v19 = vrot.slane %v7323_v39, %v7255_v43  ;;  %v6791_v43 = vld [vmem:[#allocation8 + $0x8c0] ss:$12 sps:$4 sm:$0xff]  }
 0x326   : > { %v3363_v21 = vpop.f32.mrf.mxu1  ;;  %v3401_v25 = vadd.f32 %v5821_v53, %v7312_v26  ;;  %v3547_v26 = vrot.slane %v7323_v39, %v7241_v18  ;;  %v6794_v39 = vld [vmem:[#allocation8 + $0x7e8] ss:$12 sps:$4 sm:$0xff]  }
 0x327   : > { %v5823_v28 = vpop.f32.mrf.mxu0 }
 0x328   : > { %v3364_v27 = vpop.f32.mrf.mxu1 }
 0x342   : > { %v5841_v9 = vpop.f32.mrf.mxu1 }
 0x344   : > { %v5842_v31 = vpop.f32.mrf.mxu1 }
 0x345   : > { %v5843_v33 = vadd.f32 %v5842_v31, %v5841_v9  ;;  %v6789_v31 = vld [vmem:[#allocation8 + $0x8d8] ss:$12 sps:$4 sm:$0xff]  }
 0x346   : > { %v5844_v34 = vpop.f32.mrf.mxu1 }
 0x347   : > { %v7321_v35 = vadd.f32 %v5843_v33, %v3401_v25  ;;  %v6790_v33 = vld [vmem:[#allocation8 + $0x818] ss:$12 sps:$4 sm:$0xff]   ;;  %v6792_v34 = vld [vmem:[#allocation8 + $0x800] ss:$12 sps:$4 sm:$0xff]  }
 0x348   : > { %v5845_v38 = vpop.f32.mrf.mxu1 }
 0x349   : > { %v6793_v38 = vld [vmem:[#allocation8 + $0x8a8] ss:$12 sps:$4 sm:$0xff]  }
 0x361   : > { %v4078_v45 = vpop.f32.mrf.mxu0 }
 0x362   : > { %v4119_v40 = vpop.f32.mrf.mxu1  ;;  %v4079_v46 = vadd.f32 %v4078_v45, %v3547_v26  ;;  %v6795_v26 = vld [vmem:[#allocation8 + $0x890] ss:$12 sps:$4 sm:$0xff]   ;;  %v6798_v45 = vld [vmem:[#allocation8 + $0x7b8] ss:$12 sps:$4 sm:$0xff]  }
 0x363   : > { %v4080_v48 = vpop.f32.mrf.mxu0 }
 0x364   : > { %v4121_v47 = vpop.f32.mrf.mxu1  ;;  %v4120_v49 = vadd.f32 %v4119_v40, %v4079_v46  ;;  %v4081_v50 = vadd.f32 %v4080_v48, %v3551_v44  ;;  %v6796_v40 = vld [vmem:[#allocation8 + $0x7d0] ss:$12 sps:$4 sm:$0xff]   ;;  %v6797_v44 = vld [vmem:[#allocation8 + $0x878] ss:$12 sps:$4 sm:$0xff]   ;;  %v6799_v46 = vld [vmem:[#allocation8 + $0x860] ss:$12 sps:$4 sm:$0xff]  }
 0x365   : > { %v4082_v55 = vpop.f32.mrf.mxu0  ;;  %v6801_v48 = vld [vmem:[#allocation8 + $0x848] ss:$12 sps:$4 sm:$0xff]  }
 0x366   : > { %v4123_v52 = vpop.f32.mrf.mxu1  ;;  %v4122_v57 = vadd.f32 %v4121_v47, %v4081_v50  ;;  %v4208_v59 = vmax.f32 %v4120_v49, 0.0  ;;  %v6800_v47 = vld [vmem:[#allocation8 + $0x7a0] ss:$12 sps:$4 sm:$0xff]   ;;  %v6802_v49 = vld [vmem:[#allocation8 + $0x788] ss:$12 sps:$4 sm:$0xff]  }
 0x367   : > { %v4083_v51 = vpop.f32.mrf.mxu0 }
 0x368   : > { %v4124_v58 = vpop.f32.mrf.mxu1  ;;  %v4209_v60 = vmax.f32 %v4122_v57, 0.0  ;;  %v4212_v62 = vpack.c.bf16 %v4208_v59, %v4208_v59 }
 0x36a   : > { %v4213_v36 = vpack.c.bf16 %v4209_v60, %v4209_v60 }
 0x36c   : > { %4888 = vmatprep.mubr.bf16.mxu0 %v4213_v36 }
 0x36d   : > { %4889 = vmatmul.mubr.bf16.vlgmr.msra.gmra.mxu0 %v4212_v62 }
 0x36e   : > { %5848 = vmatpush3.bf16.msra.mxu0 %v6727_v61  ;;  %4970 = vmatprep.mubr.bf16.mxu0 %v4213_v36  ;;  %v5021_v36 = vld [vmem:[#allocation10] sm:$0x7] }
 0x36f   : > { %5849 = vmatprep.subr.bf16.mxu0 %v6731_v63  ;;  %v5026_v63 = vrot.slane %v5021_v36, %v7241_v18 }
 0x372   : > { %5850 = vmatpush3.bf16.msra.mxu0 %v6732_v1 }
 0x373   : > { %5851 = vmatprep.subr.bf16.mxu0 %v6736_v3 }
 0x376   : > { %5852 = vmatpush3.bf16.msra.mxu0 %v6737_v4 }
 0x377   : > { %5853 = vmatprep.subr.bf16.mxu0 %v6741_v37  ;;  %v5030_v37 = vrot.slane %v5021_v36, %v7243_v23  ;;  %v5034_v23 = vrot.slane %v5021_v36, %v7253_v42 }
 0x37a   : > { %5854 = vmatpush3.bf16.msra.mxu0 %v6742_v41 }
 0x37b   : > { %5855 = vmatprep.subr.bf16.mxu0 %v6746_v5 }
 0x37e   : > { %5856 = vmatpush3.bf16.msra.mxu0 %v6747_v6 }
 0x37f   : > { %5857 = vmatprep.subr.bf16.mxu0 %v6751_v56 }
 0x381   : > { %v4201_v54 = vpop.f32.mrf.mxu0 }
 0x382   : > { %5858 = vmatpush3.bf16.msra.mxu0 %v6752_v7 }
 0x383   : > { %5859 = vmatprep.subr.bf16.mxu0 %v6756_v8  ;;  %v4203_v12 = vpop.f32.mrf.mxu0 }
 0x385   : > { %v4205_v13 = vpop.f32.mrf.mxu0 }
 0x386   : > { %5860 = vmatpush3.bf16.msra.mxu0 %v6757_v10 }
 0x387   : > { %5861 = vmatprep.subr.bf16.mxu0 %v6761_v11  ;;  %v4206_v15 = vpop.f32.mrf.mxu0 }
 0x38a   : > { %5862 = vmatpush3.bf16.msra.mxu0 %v6762_v14 }
 0x38d   : > { %4971 = vmatmul.mubr.bf16.vlgmr.msra.gmra.mxu0 %v4212_v62 }
 0x3a2   : > { %v4160_v0 = vpop.f32.mrf.mxu1 }
 0x3a3   : > { %v4161_v53 = vadd.f32 %v4160_v0, %v3555_v16 }
 0x3a4   : > { %v4162_v20 = vpop.f32.mrf.mxu1 }
 0x3a5   : > { %v4202_v21 = vadd.f32 %v4201_v54, %v4161_v53  ;;  %v4163_v22 = vadd.f32 %v4162_v20, %v3559_v19 }
 0x3a6   : > { %v4164_v24 = vpop.f32.mrf.mxu1 }
 0x3a7   : > { %v4204_v25 = vadd.f32 %v4203_v12, %v4163_v22  ;;  %v4210_v27 = vmax.f32 %v4202_v21, 0.0 }
 0x3a8   : > { %v4165_v28 = vpop.f32.mrf.mxu1 }
 0x3a9   : > { %v4211_v29 = vmax.f32 %v4204_v25, 0.0  ;;  %v4214_v9 = vpack.c.bf16 %v4210_v27, %v4210_v27 }
 0x3ab   : > { %v4215_v2 = vpack.c.bf16 %v4211_v29, %v4211_v29 }
 0x3ad   : > { %4929 = vmatprep.mubr.bf16.mxu1 %v4215_v2 }
 0x3ae   : > { %4930 = vmatmul.mubr.bf16.vlgmr.msra.gmra.mxu1 %v4214_v9 }
 0x3af   : > { %5870 = vmatpush3.bf16.msra.mxu1 %v6788_v30  ;;  %5010 = vmatprep.mubr.bf16.mxu1 %v4215_v2 }
 0x3b0   : > { %5871 = vmatprep.subr.bf16.mxu1 %v6789_v31 }
 0x3b3   : > { %5872 = vmatpush3.bf16.msra.mxu1 %v6790_v33 }
 0x3b4   : > { %5873 = vmatprep.subr.bf16.mxu1 %v6791_v43 }
 0x3b7   : > { %5874 = vmatpush3.bf16.msra.mxu1 %v6792_v34 }
 0x3b8   : > { %5875 = vmatprep.subr.bf16.mxu1 %v6793_v38 }
 0x3bb   : > { %5876 = vmatpush3.bf16.msra.mxu1 %v6794_v39 }
 0x3bc   : > { %5877 = vmatprep.subr.bf16.mxu1 %v6795_v26 }
 0x3bf   : > { %5878 = vmatpush3.bf16.msra.mxu1 %v6796_v40 }
 0x3c0   : > { %5879 = vmatprep.subr.bf16.mxu1 %v6797_v44 }
 0x3c3   : > { %5880 = vmatpush3.bf16.msra.mxu1 %v6798_v45 }
 0x3c4   : > { %5881 = vmatprep.subr.bf16.mxu1 %v6799_v46 }
 0x3c7   : > { %5882 = vmatpush3.bf16.msra.mxu1 %v6800_v47 }
 0x3c8   : > { %5883 = vmatprep.subr.bf16.mxu1 %v6801_v48 }
 0x3cb   : > { %5884 = vmatpush3.bf16.msra.mxu1 %v6802_v49 }
 0x3ce   : > { %5011 = vmatmul.mubr.bf16.vlgmr.msra.gmra.mxu1 %v4214_v9 }
 0x42d   : > { %v4890_v50 = vpop.f32.mrf.mxu0 }
 0x42f   : > { %v4892_v52 = vpop.f32.mrf.mxu0 }
 0x431   : > { %v4894_v55 = vpop.f32.mrf.mxu0 }
 0x433   : > { %v4895_v57 = vpop.f32.mrf.mxu0 }
 0x44d   : > { %v5863_v58 = vpop.f32.mrf.mxu0 }
 0x44f   : > { %v5864_v59 = vpop.f32.mrf.mxu0 }
 0x450   : > { %v5865_v54 = vadd.f32 %v5864_v59, %v5863_v58 }
 0x451   : > { %v5866_v51 = vpop.f32.mrf.mxu0 }
 0x453   : > { %v5867_v60 = vpop.f32.mrf.mxu0 }
 0x46e   : > { %v4931_v61 = vpop.f32.mrf.mxu1 }
 0x46f   : > { %v4932_v62 = vadd.f32 %v4931_v61, %v4890_v50 }
 0x470   : > { %v4933_v1 = vpop.f32.mrf.mxu1 }
 0x471   : > { %v5018_v3 = vadd.f32 %v4932_v62, %v7316_v17  ;;  %v4934_v4 = vadd.f32 %v4933_v1, %v4892_v52 }
 0x472   : > { %v4935_v41 = vpop.f32.mrf.mxu1 }
 0x473   : > { %v5038_v5 = vadd.f32 %v5026_v63, %v5018_v3  ;;  %v5019_v6 = vadd.f32 %v4934_v4, %v7318_v32 }
 0x474   : > { %v4936_v56 = vpop.f32.mrf.mxu1 }
 0x475   : > { %5041 = vst [vmem:[%s294_s25] sm:$0xff] %v5038_v5  ;;  %v5039_v7 = vadd.f32 %v5030_v37, %v5019_v6 }
 0x477   : > { %5042 = vst [vmem:[%s294_s25 + $0x8] sm:$0xff] %v5039_v7 }
 0x48e   : > { %v5885_v8 = vpop.f32.mrf.mxu1 }
 0x490   : > { %v5886_v18 = vpop.f32.mrf.mxu1 }
 0x491   : > { %v5887_v17 = vadd.f32 %v5886_v18, %v5885_v8 }
 0x492   : > { %v5888_v10 = vpop.f32.mrf.mxu1 }
 0x493   : > { %v5013_v11 = vadd.f32 %v5887_v17, %v5865_v54 }
 0x494   : > { %v5889_v12 = vpop.f32.mrf.mxu1 }
 0x495   : > { %v5020_v32 = vadd.f32 %v5013_v11, %v7321_v35 }
 0x497   : > { %v5040_v13 = vadd.f32 %v5034_v23, %v5020_v32 }
 0x499   : > { %5043 = vst [vmem:[%s294_s25 + $0x10] sm:$0xff] %v5040_v13 }
 0x49a   : > { %6948 = shalt.err (!%p6945_p11)
}
 0x49b   : > { %s6949_s23 = scalar_lea.hbm %s5057_s6, 384  ;;  %s6953_s30 = scalar_lea.hbm %s7381_s5, 768 }
 0x49c   : > { %p6950_p12 = scmp.ne.s32.totalorder %s5057_s6, %s6949_s23  ;;  %p6954_p4 = scmp.lt.s32.totalorder %s5057_s6, %s7381_s5 }
 0x49d   : > { %p6955_p13 = scmp.lt.s32.totalorder %s6953_s30, %s6949_s23 }
 0x49e   : > { %p6951_p1 = pnand %p6950_p12, %p7398_p7 }
 0x49f   : > { %p6956_p5 = por %p6955_p13, %p6954_p4 }
 0x4a0   : > { %p6952_p3 = pneg %p6951_p1 }
 0x4a2   : > { %p6957_p8 = pnand %p6956_p5, %p6952_p3 }
 0x4a4   : > { %6960 = shalt.err (!%p6957_p8)
}
 0x4a5   : > { %5913 = dma.vmem_to_hbm [thread:$0]  (%p7398_p7), %s5060_s17, 384, %s5057_s6, %s5045_s22  }
 0x4a6 PF: > { %s5071_s25 = sand.u32 1, %s6995_s18   ;;  %p7399_p10 = scmp.ne.s32.totalorder %s7390_s14, 0 }
 0x4a7   : > { %p7400_p6 = scmp.ge.s32.totalorder %s7007_s21, 2  ;;  %s5072_s11 = scalar_lea.sflag [#allocation4], %s5071_s25 }
 0x4a9   : > { %p5933_p0 = pnand %p7400_p6, %p7399_p10 }
 0x4ab   : > { %p5934_p2 = pneg %p5933_p0 }
 0x4ad   : > { %6990 = dma.done.wait (%p5934_p2), %s5072_s11, 384  }
 0x4ae   : > { %6992 = vsyncadd (%p5934_p2), %s5072_s11, 4294966912  ;;  %p20_p9 = scmp.ge.s32.totalorder %s7135_s28, 4   ;;  %s7401_s18 = smov %s6999_s19 }
 0x4af   : > { %s7402_s19 = smov %s7003_s20  ;;  %s7403_s20 = smov %s7146_s10 }
 0x4b0   : > { %s7404_s21 = smov %s7135_s28  ;;  %22 = sbr.rel (!%p20_p9) target bundleno = 7 (0x7), region = 101 }
 0x4b5   :  { %5077 = vsyncpa [#allocation3], 1 }
 0x4b6   :  { %5079 = vsyncpa [#allocation3 + $0x1], 1 }
 0x4b7   :  { %5080 = vsyncpa [#allocation6], 1 }
 0x4b8   :  { %5081 = vsyncpa [#allocation9], 1 }
 0x4b9   :  { %5082 = vsyncpa [#allocation4], 1 }
 0x4ba   :  { %5084 = vsyncpa [#allocation4 + $0x1], 1 }

</bundles_post_ra>
